<compile_context>
chip_gen: v5e
topology: v5e:2x2
jax: 0.10.0
libtpu: 0.0.40
codegen_flags: <defaults>
</compile_context>

<pallas_src>
import jax
import jax.numpy as jnp
from jax.experimental import pallas as pl
from jax.experimental.pallas import tpu as pltpu

N_CHR = 23  # the reference forward hard-codes `for ch in range(23)`


# ------------------------------- kernel -----------------------------------

def _rbf_embed_kernel(pos_ref, ctr_ref, lv_ref, emb_ref, out_ref):
    # pos_ref: (1, C, L) f32      ctr_ref / lv_ref: (C, M) f32
    # emb_ref: (C, M, E) bf16     out_ref: (1, C, L, E) f32
    pos = pos_ref[0]                                     # (C, L)
    inv_var = jnp.exp(-lv_ref[...])                      # (C, M) == 1/exp(log_var)
    d = pos[:, :, None] - ctr_ref[...][:, None, :]       # (C, L, M)
    # exp(-(d^2)/(2*var)) == exp(-0.5 * d^2 * exp(-log_var)): no vector divide.
    g = jnp.exp(-0.5 * (d * d) * inv_var[:, None, :])    # (C, L, M), f32
    # softmax over the RBF-center axis (== F.softmax(weights, dim=-1))
    g = g - jnp.max(g, axis=-1, keepdims=True)
    p = jnp.exp(g)
    p = p * pl.reciprocal(jnp.sum(p, axis=-1, keepdims=True), approx=True)
    # Batched-over-chromosome matmul on the MXU: bf16 inputs, f32 accumulation.
    o = jnp.einsum("clm,cme->cle",
                   p.astype(jnp.bfloat16), emb_ref[...],
                   preferred_element_type=jnp.float32)   # (C, L, E)
    out_ref[0] = o.astype(out_ref.dtype)


# ------------------------------- wrapper -----------------------------------

def radial_basis_embedding_chr(chromosome, position, params):
    """Fused Pallas forward of RadialBasisEmbeddingChr.

    `chromosome` is accepted for API parity but — exactly as in the PyTorch
    reference forward — never used.
    """
    del chromosome
    emb = params["embeddings"][:N_CHR]                    # (C, M, E) f32 param
    ctr = params["centers"][:N_CHR]                       # (C, M) f32
    lv = params["log_variances"][:N_CHR]                  # (C, M) f32
    pos = position[:, :N_CHR, :].astype(jnp.float32)      # (B, C, L)

    B, C, L = pos.shape
    _, M, E = emb.shape

    # Store/DMA the (large) embedding table in bf16; matmul accumulates in f32.
    emb_bf16 = emb.astype(jnp.bfloat16)

    flops = 2 * B * C * L * M * E + 8 * B * C * L * M
    transcendentals = 2 * B * C * L * M + B * C * M
    bytes_accessed = (pos.size * 4 + ctr.size * 4 + lv.size * 4
                      + B * emb_bf16.size * 2 + B * C * L * E * 4)

    out4 = pl.pallas_call(
        _rbf_embed_kernel,
        out_shape=jax.ShapeDtypeStruct((B, C, L, E), jnp.float32),
        grid=(B,),
        in_specs=[
            pl.BlockSpec((1, C, L), lambda b: (b, 0, 0)),        # position
            pl.BlockSpec((C, M), lambda b: (0, 0)),              # centers
            pl.BlockSpec((C, M), lambda b: (0, 0)),              # log_variances
            pl.BlockSpec((C, M, E), lambda b: (0, 0, 0)),        # embeddings
        ],
        out_specs=pl.BlockSpec((1, C, L, E), lambda b: (b, 0, 0, 0)),
        compiler_params=pltpu.CompilerParams(
            dimension_semantics=("parallel",)),
        cost_estimate=pl.CostEstimate(
            flops=int(flops),
            transcendentals=int(transcendentals),
            bytes_accessed=int(bytes_accessed)),
    )(pos, ctr, lv, emb_bf16)

    # (B, C, L, E) -> (B, C*L, E): contiguous, free reshape outside the kernel.
    return out4.reshape(B, C * L, E)


# ----------------------- parameters & pure-JAX reference -------------------

def init_params(key, n_chromosomes, embedding_dim, n_emb_per_chr):
    embeddings = jax.random.normal(
        key, (n_chromosomes, n_emb_per_chr, embedding_dim), jnp.float32)
    # PyTorch stores centers / log_variances as (1, 1, C, M); we keep the same
    # values as (C, M) — identical semantics, simpler BlockSpecs.
    centers = jnp.tile(jnp.linspace(0.0, 1.0, n_emb_per_chr)[None, :],
                       (n_chromosomes, 1)).astype(jnp.float32)
    log_variances = jnp.full((n_chromosomes, n_emb_per_chr), -5.0, jnp.float32)
    return {"embeddings": embeddings, "centers": centers,
            "log_variances": log_variances}


def _reference_forward(position, params):
    # Direct transcription of the PyTorch forward (pure JAX, f32).
    emb = params["embeddings"]
    ctr = params["centers"]
    lv = params["log_variances"]
    outs = []
    for ch in range(N_CHR):
        pos = position[:, ch, :][..., None]                 # (B, L, 1)
        var = jnp.exp(lv[ch])[None, None, :]                # (1, 1, M)
        c = ctr[ch][None, None, :]                          # (1, 1, M)
        w = jnp.exp(-((pos - c) ** 2) / (2.0 * var))        # (B, L, M)
        w = jax.nn.softmax(w, axis=-1)
        outs.append(w @ emb[ch])                            # (B, L, E)
    out = jnp.stack(outs, axis=1)                           # (B, C, L, E)
    return out.reshape(position.shape[0], -1, emb.shape[-1])


# --------------------------------- main -------------------------------------

if __name__ == "__main__":
    B, L = 2, 16                # batch, positions per chromosome
    N_EMB_PER_CHR = 128         # M (module default 512; small test value)
    EMB_DIM = 128               # E — multiple of 128 so output stores are lane-dense

    key = jax.random.PRNGKey(0)
    kp, kpos, kchr = jax.random.split(key, 3)
    params = init_params(kp, N_CHR, EMB_DIM, N_EMB_PER_CHR)
    position = jax.random.uniform(kpos, (B, N_CHR, L), jnp.float32)
    chromosome = jax.random.randint(kchr, (B, N_CHR), 0, N_CHR)  # unused (as in ref)

    fwd = jax.jit(radial_basis_embedding_chr)
    out = fwd(chromosome, position, params)
    out = jax.block_until_ready(out)

    assert out.shape == (B, N_CHR * L, EMB_DIM)

    ref = _reference_forward(position, params)
    max_err = float(jnp.max(jnp.abs(out - ref)))
    assert jnp.allclose(out, ref, atol=2e-2, rtol=2e-2), max_err

    print("KERNEL_OK")
</pallas_src>

<mosaic_0001>
module attributes {stable_mosaic.version = 11 : i64} {
  func.func @_rbf_embed_kernel(%arg0: i32, %arg1: memref<1x23x16xf32, #tpu.memory_space<vmem>>, %arg2: memref<23x128xf32, #tpu.memory_space<vmem>>, %arg3: memref<23x128xf32, #tpu.memory_space<vmem>>, %arg4: memref<23x128x128xbf16, #tpu.memory_space<vmem>>, %arg5: memref<1x23x16x128xf32, #tpu.memory_space<vmem>>) attributes {dimension_semantics = [#tpu.dimension_semantics<parallel>], iteration_bounds = array<i64: 2>, scalar_prefetch = 0 : i64, scratch_operands = 0 : i64, tpu.core_type = #tpu.core_type<tc>, window_params = [{transform_indices = @transform_0, window_bounds = array<i64: 1, 23, 16>}, {pipeline_mode = #tpu.pipeline_mode<synchronous>, transform_indices = @transform_1, window_bounds = array<i64: 23, 128>}, {pipeline_mode = #tpu.pipeline_mode<synchronous>, transform_indices = @transform_2, window_bounds = array<i64: 23, 128>}, {pipeline_mode = #tpu.pipeline_mode<synchronous>, transform_indices = @transform_3, window_bounds = array<i64: 23, 128, 128>}, {transform_indices = @transform_4, window_bounds = array<i64: 1, 23, 16, 128>}]} {
    %c0 = arith.constant 0 : index
    %c0_0 = arith.constant 0 : index
    %c0_1 = arith.constant 0 : index
    %0 = vector.load %arg1[%c0, %c0_0, %c0_1] : memref<1x23x16xf32, #tpu.memory_space<vmem>>, vector<1x23x16xf32>
    %1 = vector.shape_cast %0 : vector<1x23x16xf32> to vector<23x16xf32>
    %c0_2 = arith.constant 0 : index
    %c0_3 = arith.constant 0 : index
    %2 = vector.load %arg3[%c0_2, %c0_3] : memref<23x128xf32, #tpu.memory_space<vmem>>, vector<23x128xf32>
    %cst = arith.constant 0.000000e+00 : f32
    %3 = vector.broadcast %cst : f32 to vector<23x128xf32>
    %4 = arith.subf %3, %2 : vector<23x128xf32>
    %5 = math.exp %4 : vector<23x128xf32>
    %6 = vector.shape_cast %1 : vector<23x16xf32> to vector<23x16x1xf32>
    %c0_4 = arith.constant 0 : index
    %c0_5 = arith.constant 0 : index
    %7 = vector.load %arg2[%c0_4, %c0_5] : memref<23x128xf32, #tpu.memory_space<vmem>>, vector<23x128xf32>
    %8 = vector.shape_cast %7 : vector<23x128xf32> to vector<23x1x128xf32>
    %9 = vector.broadcast %6 : vector<23x16x1xf32> to vector<23x16x128xf32>
    %10 = vector.broadcast %8 : vector<23x1x128xf32> to vector<23x16x128xf32>
    %11 = arith.subf %9, %10 : vector<23x16x128xf32>
    %12 = arith.mulf %11, %11 : vector<23x16x128xf32>
    %cst_6 = arith.constant -5.000000e-01 : f32
    %13 = vector.broadcast %cst_6 : f32 to vector<23x16x128xf32>
    %14 = arith.mulf %13, %12 : vector<23x16x128xf32>
    %15 = vector.shape_cast %5 : vector<23x128xf32> to vector<23x1x128xf32>
    %16 = vector.broadcast %15 : vector<23x1x128xf32> to vector<23x16x128xf32>
    %17 = arith.mulf %14, %16 : vector<23x16x128xf32>
    %18 = math.exp %17 : vector<23x16x128xf32>
    %cst_7 = arith.constant dense<0xFF800000> : vector<23x16xf32>
    %19 = vector.multi_reduction <maximumf>, %18, %cst_7 [2] : vector<23x16x128xf32> to vector<23x16xf32>
    %20 = vector.shape_cast %19 : vector<23x16xf32> to vector<23x16x1xf32>
    %21 = vector.broadcast %20 : vector<23x16x1xf32> to vector<23x16x128xf32>
    %22 = arith.subf %18, %21 : vector<23x16x128xf32>
    %23 = math.exp %22 : vector<23x16x128xf32>
    %cst_8 = arith.constant dense<0.000000e+00> : vector<23x16xf32>
    %24 = vector.multi_reduction <add>, %23, %cst_8 [2] : vector<23x16x128xf32> to vector<23x16xf32>
    %25 = vector.shape_cast %24 : vector<23x16xf32> to vector<23x16x1xf32>
    %26 = tpu.reciprocal %25 {approx = true} : vector<23x16x1xf32> -> vector<23x16x1xf32>
    %27 = vector.broadcast %26 : vector<23x16x1xf32> to vector<23x16x128xf32>
    %28 = arith.mulf %23, %27 : vector<23x16x128xf32>
    %29 = arith.truncf %28 : vector<23x16x128xf32> to vector<23x16x128xbf16>
    %c0_9 = arith.constant 0 : index
    %c0_10 = arith.constant 0 : index
    %c0_11 = arith.constant 0 : index
    %30 = vector.load %arg4[%c0_9, %c0_10, %c0_11] : memref<23x128x128xbf16, #tpu.memory_space<vmem>>, vector<23x128x128xbf16>
    "tpu.trace_start"() <{level = 10 : i32, message = "clm,cme->cle"}> : () -> ()
    %cst_12 = arith.constant dense<0.000000e+00> : vector<23x16x128xf32>
    %31 = tpu.matmul %29, %30, %cst_12 {dimension_numbers = #tpu.dot_dimension_numbers<[2], [1], [1], [2], [0, 0, 0, 1, 1, 2], [0], [0]>} : vector<23x16x128xbf16>, vector<23x128x128xbf16>, vector<23x16x128xf32> -> vector<23x16x128xf32>
    "tpu.trace_stop"() : () -> ()
    %c0_13 = arith.constant 0 : index
    %c0_14 = arith.constant 0 : index
    %c0_15 = arith.constant 0 : index
    %c0_16 = arith.constant 0 : index
    %32 = vector.load %arg5[%c0_13, %c0_14, %c0_15, %c0_16] : memref<1x23x16x128xf32, #tpu.memory_space<vmem>>, vector<1x23x16x128xf32>
    %33 = vector.shape_cast %32 : vector<1x23x16x128xf32> to vector<23x16x128xf32>
    %34 = vector.shape_cast %31 : vector<23x16x128xf32> to vector<1x23x16x128xf32>
    tpu.vector_store %arg5[%c0_13, %c0_14, %c0_15, %c0_16], %34 {strides = array<i32>} : memref<1x23x16x128xf32, #tpu.memory_space<vmem>>, vector<1x23x16x128xf32>,
    return
  }
  func.func @transform_0(%arg0: i32) -> (i32, i32, i32) {
    %c0_i32 = arith.constant 0 : i32
    %c0_i32_0 = arith.constant 0 : i32
    %c0_i32_1 = arith.constant 0 : i32
    return %arg0, %c0_i32, %c0_i32_0 : i32, i32, i32
  }
  func.func @transform_1(%arg0: i32) -> (i32, i32) {
    %c0_i32 = arith.constant 0 : i32
    %c0_i32_0 = arith.constant 0 : i32
    %c0_i32_1 = arith.constant 0 : i32
    return %c0_i32, %c0_i32_0 : i32, i32
  }
  func.func @transform_2(%arg0: i32) -> (i32, i32) {
    %c0_i32 = arith.constant 0 : i32
    %c0_i32_0 = arith.constant 0 : i32
    %c0_i32_1 = arith.constant 0 : i32
    return %c0_i32, %c0_i32_0 : i32, i32
  }
  func.func @transform_3(%arg0: i32) -> (i32, i32, i32) {
    %c0_i32 = arith.constant 0 : i32
    %c0_i32_0 = arith.constant 0 : i32
    %c0_i32_1 = arith.constant 0 : i32
    %c0_i32_2 = arith.constant 0 : i32
    return %c0_i32, %c0_i32_0, %c0_i32_1 : i32, i32, i32
  }
  func.func @transform_4(%arg0: i32) -> (i32, i32, i32, i32) {
    %c0_i32 = arith.constant 0 : i32
    %c0_i32_0 = arith.constant 0 : i32
    %c0_i32_1 = arith.constant 0 : i32
    %c0_i32_2 = arith.constant 0 : i32
    return %arg0, %c0_i32, %c0_i32_0, %c0_i32_1 : i32, i32, i32, i32
  }
}

</mosaic_0001>

<bundles_post_ra>
// kernel: radial_basis_embedding_chr.1
= control target key start
LH: loop header
LB: loop body
LE: loop exit
PB: predicated region body
PF: predicated region fallthrough
CT: control target
= control target key end

     0   :  { %9 = vsyncpa [#allocation3], 0  ;;  %s6106_s0 = inlined_call_operand.vmem [shape: f32[2,23,16], index: 0, kind: input, shape index: {}]   ;;  %s6107_s1 = inlined_call_operand.vmem [shape: f32[23,128], index: 1, kind: input, shape index: {}]   ;;  %s6108_s2 = inlined_call_operand.vmem [shape: f32[23,128], index: 2, kind: input, shape index: {}]   ;;  %s6109_s3 = inlined_call_operand.vmem [shape: bf16[23,128,128], index: 3, kind: input, shape index: {}]   ;;  %s6110_s4 = inlined_call_operand.hbm [shape: f32[2,23,16,128], index: 4, kind: output, shape index: {}]  }
   0x1   :  { %11 = vsyncpa [#allocation3 + $0x1], 0  ;;  %s4803_s15 = smov 0   ;;  %s4805_s16 = smov 0  }
   0x2   :  { %s4807_s17 = smov 0   ;;  %s4809_s18 = smov 0  }
   0x3 LB: > { %s4824_s19 = sadd.s32 4294967295, %s4774_s18   ;;  %s3443_s20 = sadd.s32 4294967294, %s4774_s18   ;;  %s4774_s18 = sphi %s4809_s18, %s6133_s18   ;;  %s4770_s17 = sphi %s4807_s17, %s6132_s17   ;;  %s4766_s16 = sphi %s4805_s16, %s6131_s16   ;;  %s4762_s15 = sphi %s4803_s15, %s6130_s15  }
   0x4   : > { %s4828_s21 = sadd.s32 1, %s4774_s18   ;;  %s113_s22 = sadd.s32 1, %s4770_s17 }
   0x5   : > { %s110_s23 = ssub.s32 %s4774_s18, %s4828_s21  ;;  %p123_p0 = scmp.ne.s32.totalorder %s4770_s17, %s4766_s16 }
   0x6   : > { %p111_p1 = scmp.eq.s32.totalorder %s110_s23, 0  ;;  %p124_p2 = scmp.eq.s32.totalorder %s4824_s19, 1 }
   0x7   : > { %p129_p3 = scmp.ne.s32.totalorder %s4766_s16, %s4762_s15  ;;  %p130_p4 = scmp.eq.s32.totalorder %s3443_s20, 1 }
   0x8   : > { %s4839_s24 = scalar_select %p111_p1, %s4770_s17, %s113_s22  }
   0x9   : > { %p4841_p5 = por %p124_p2, %p123_p0  ;;  %p4845_p6 = por %p130_p4, %p129_p3 }
   0xa   : > { %p3446_p7 = scmp.ge.s32.totalorder %s4774_s18, 1  ;;  %p165_p8 = scmp.lt.s32.totalorder %s4774_s18, 3 }
   0xc   : > { %p166_p9 = pnand %p3446_p7, %p165_p8 }
   0xe   : > { %169 = sbr.rel (%p166_p9) target bundleno = 899 (0x383), region = 36 }
  0x13   : > { %v212_v0 = vlaneseq  ;;  %p191_p10 = scmp.lt.s32.totalorder %s4824_s19, 1  ;;  %v199_v18 = vld [vmem:[%s6108_s2] sm:$0xff]  ;;  %s188_s7 = sand.u32 1, %s4766_s16  }
  0x14   : > { %v202_v19 = vsub.f32 0.0, %v199_v18  ;;  %v4898_v20 = vld [vmem:[%s6107_s1] sm:$0xff]  ;;  %s4371_s14 = smul.u32 368, %s188_s7  ;;  %s3366_s20 = scalar_lea.sflag [#allocation3], %s188_s7 }
  0x15   : > { %v4852_v1 = vshrl.u32 %v212_v0, 7  ;;  %s192_s27 = scalar_select %p191_p10, %s4824_s19, 1  ;;  %v517_v23 = vrot.slane %v4898_v20, 2  ;;  %v516_v34 = vrot.slane %v4898_v20, 1  ;;  %v521_v53 = vrot.slane %v4898_v20, 6 }
  0x16   : > { %v205_v21 = vmul.f32 1.442695, %v202_v19  ;;  %v518_v60 = vrot.slane %v4898_v20, 3  ;;  %v536_v63 = vperm.slane %v4898_v20, 0  ;;  %s5894_s6 = scalar_lea.vmem [#allocation2], %s4371_s14  ;;  %s4373_s9 = smul.u32 368, %s4824_s19 }
  0x17   : > { %4417 = vset.pattern.permute.xlu2 %v4852_v1  ;;  %4416 = vset.pattern.permute.xlu1 %v4852_v1  ;;  %v4858_v2 = vadd.s32 8, %v4852_v1  ;;  %s4372_s28 = smul.u32 24, %s192_s27  ;;  %v538_v24 = vperm.slane %v517_v23, 0  ;;  %v537_v37 = vperm.slane %v516_v34, 0  ;;  %v542_v54 = vperm.slane %v521_v53, 0  ;;  %s3378_s13 = sshll.u32 %s5894_s6, 4  ;;  %s3379_s13 = int_to_ptr.vmem [resolvable:$true] %s3378_s13 }
  0x18   : > { %4430 = vpow2.f32 %v205_v21  ;;  %s3377_s12 = scalar_lea.hbm %s6110_s4, %s4373_s9 }
  0x19   : > { %4415 = vset.pattern.permute.xlu0 %v4858_v2  ;;  %s195_s5 = scalar_lea.vmem %s6106_s0, %s4372_s28  ;;  %s3380_s14 = sshll.u32 %s3377_s12, 4  ;;  %s3381_s14 = int_to_ptr.hbm [resolvable:$true] %s3380_s14 }
  0x1a   : > { %v4864_v3 = vld [vmem:[%s195_s5] sm:$0xff]  ;;  %v4872_v8 = vld [vmem:[%s195_s5 + $0x8] sm:$0xff]  ;;  %v4875_v10 = vld [vmem:[%s195_s5 + $0x10] sm:$0x7f]  ;;  %s4726_s22 = sshra.s32 %s3381_s14, 4  ;;  %s4732_s28 = scalar_lea.hbm %s6110_s4, 736  ;;  %s4727_s22 = int_to_ptr.hbm [resolvable:$true] %s4726_s22 }
  0x1b   : > { %v237_v4 = vperm.slane %v4864_v3, 2  ;;  %v224_v5 = vperm.slane %v4864_v3, 1  ;;  %v211_v6 = vperm.slane %v4864_v3, 0  ;;  %v289_v7 = vperm.slane %v4864_v3, 6  ;;  %s4728_s19 = scalar_lea.hbm %s4727_s22, 368  ;;  %p4733_p0 = scmp.lt.s32.totalorder %s4727_s22, %s6110_s4 }
  0x1c   : > { %v354_v9 = vperm.slane %v4872_v8, 3  ;;  %v250_v11 = vperm.slane %v4864_v3, 3  ;;  %v419_v12 = vperm.slane %v4875_v10, 0  ;;  %v276_v13 = vperm.slane %v4864_v3, 5  ;;  %p4729_p11 = scmp.ne.s32.totalorder %s4727_s22, %s4728_s19  ;;  %p4734_p1 = scmp.lt.s32.totalorder %s4732_s28, %s4728_s19 }
  0x1d   : > { %v263_v14 = vperm.slane %v4864_v3, 4  ;;  %v341_v15 = vperm.slane %v4872_v8, 2  ;;  %v406_v16 = vperm.slane %v4872_v8, 7  ;;  %v302_v17 = vperm.slane %v4864_v3, 7 }
  0x1e   : > { %v328_v22 = vperm.slane %v4872_v8, 1  ;;  %v4905_v27 = vpop.eup %4430  ;;  %v393_v32 = vperm.slane %v4872_v8, 6  ;;  %v458_v41 = vperm.slane %v4875_v10, 3  ;;  %p4730_p12 = pnand %p4729_p11, %p4841_p5  ;;  %p4735_p2 = por %p4734_p1, %p4733_p0 }
  0x1f   : > { %242 = vperm.xlu2 %4417, %v237_v4   ;;  %229 = vperm.xlu1 %4416, %v224_v5   ;;  %v724_v28 = vrot.slane %v4905_v27, 2  ;;  %v723_v38 = vrot.slane %v4905_v27, 1  ;;  %v728_v58 = vrot.slane %v4905_v27, 6 }
  0x20   : > { %p4731_p13 = pneg %p4730_p12 }
  0x21   : > { %222 = vperm.xlu0 %4415, %v211_v6   ;;  %v745_v30 = vperm.slane %v724_v28, 0  ;;  %v4914_v42 = vperm.slane %v723_v38, 0  ;;  %v749_v0 = vperm.slane %v728_v58, 0  ;;  %v743_v28 = vperm.slane %v4905_v27, 0 }
  0x22   : > { %p4736_p3 = pnand %p4735_p2, %p4731_p13 }
  0x27   : > { %4420 = vset.pattern.permute.xlu2 %v4858_v2  ;;  %4418 = vset.pattern.permute.xlu1 %v4858_v2 }
  0x29   : > { %300 = vperm.xlu0 %4415, %v289_v7  }
  0x2f   : > { %248 = vperm.xlu2 %4420, %v237_v4   ;;  %235 = vperm.xlu1 %4418, %v224_v5   ;;  %v539_v4 = vperm.slane %v518_v60, 0 }
  0x31   : > { %365 = vperm.xlu0 %4415, %v354_v9  }
  0x37   : > { %261 = vperm.xlu2 %4420, %v250_v11   ;;  %4419 = vset.pattern.permute.xlu1 %v4852_v1 }
  0x39   : > { %430 = vperm.xlu0 %4415, %v419_v12  }
  0x3f   : > { %4422 = vset.pattern.permute.xlu2 %v4852_v1  ;;  %255 = vperm.xlu1 %4419, %v250_v11   ;;  %v725_v11 = vrot.slane %v4905_v27, 3 }
  0x41   : > { %4425 = vset.pattern.permute.xlu0 %v4852_v1  ;;  %v4937_v19 = vperm.slane %v725_v11, 0 }
  0x47   : > { %281 = vperm.xlu2 %4422, %v276_v13   ;;  %4421 = vset.pattern.permute.xlu1 %v4858_v2 }
  0x49   : > { %216 = vperm.xlu0 %4425, %v211_v6  }
  0x4f   : > { %294 = vperm.xlu2 %4422, %v289_v7   ;;  %274 = vperm.xlu1 %4421, %v263_v14  }
  0x51   : > { %268 = vperm.xlu0 %4425, %v263_v14  }
  0x57   : > { %346 = vperm.xlu2 %4422, %v341_v15   ;;  %287 = vperm.xlu1 %4421, %v276_v13  }
  0x5f   : > { %359 = vperm.xlu2 %4422, %v354_v9   ;;  %4423 = vset.pattern.permute.xlu1 %v4852_v1 }
  0x67   : > { %411 = vperm.xlu2 %4422, %v406_v16   ;;  %307 = vperm.xlu1 %4423, %v302_v17  }
  0x6f   : > { %424 = vperm.xlu2 %4422, %v419_v12   ;;  %4424 = vset.pattern.permute.xlu1 %v4858_v2 }
  0x77   : > { %339 = vperm.xlu1 %4424, %v328_v22   ;;  %4427 = vset.pattern.permute.xlu2 %v4858_v2 }
  0x79   : > { %v243_v25 = vpop.permute.xlu2 %242 }
  0x7a   : > { %v586_v26 = vsub.f32 %v243_v25, %v538_v24 }
  0x7c   : > { %v632_v29 = vmul.f32 %v586_v26, %v586_v26 }
  0x7e   : > { %v678_v31 = vmul.f32 -0.5, %v632_v29 }
  0x7f   : > { %352 = vperm.xlu1 %4424, %v341_v15  }
  0x80   : > { %v793_v33 = vmul.f32 %v745_v30, %v678_v31 }
  0x82   : > { %v843_v35 = vmul.f32 1.442695, %v793_v33 }
  0x84   : > { %4432 = vpow2.f32 %v843_v35 }
  0x87   : > { %404 = vperm.xlu1 %4424, %v393_v32  }
  0x89   : > { %v249_v36 = vpop.permute.xlu2 %248 }
  0x8a   : > { %v4916_v44 = vpop.eup %4432  ;;  %v587_v62 = vsub.f32 %v249_v36, %v538_v24  ;;  %v520_v24 = vrot.slane %v4898_v20, 5 }
  0x8c   : > { %v633_v6 = vmul.f32 %v587_v62, %v587_v62  ;;  %v541_v36 = vperm.slane %v520_v24, 0 }
  0x8f   : > { %417 = vperm.xlu1 %4424, %v406_v16   ;;  %v679_v16 = vmul.f32 -0.5, %v633_v6 }
  0x91   : > { %v230_v39 = vpop.permute.xlu1 %229  ;;  %v4920_v47 = vpop.permute.xlu2 %261  ;;  %v794_v26 = vmul.f32 %v745_v30, %v679_v16 }
  0x92   : > { %v584_v40 = vsub.f32 %v230_v39, %v537_v37  ;;  %v519_v39 = vrot.slane %v4898_v20, 4  ;;  %v589_v62 = vsub.f32 %v4920_v47, %v539_v4 }
  0x93   : > { %v223_v45 = vpop.permute.xlu0 %222 }
  0x94   : > { %v630_v43 = vmul.f32 %v584_v40, %v584_v40  ;;  %v583_v7 = vsub.f32 %v223_v45, %v536_v63  ;;  %v845_v40 = vmul.f32 1.442695, %v794_v26 }
  0x96   : > { %v676_v46 = vmul.f32 -0.5, %v630_v43  ;;  %v629_v18 = vmul.f32 %v583_v7, %v583_v7 }
  0x97   : > { %469 = vperm.xlu1 %4424, %v458_v41  }
  0x98   : > { %v791_v48 = vmul.f32 %v4914_v42, %v676_v46  ;;  %935 = vmax.xlane.f32.xlu2 %v4916_v44  ;;  %v675_v29 = vmul.f32 -0.5, %v629_v18 }
  0x9a   : > { %v839_v49 = vmul.f32 1.442695, %v791_v48 }
  0x9b   : > { %v301_v50 = vpop.permute.xlu0 %300 }
  0x9c   : > { %4434 = vpow2.f32 %v839_v49  ;;  %v595_v31 = vsub.f32 %v301_v50, %v542_v54  ;;  %v540_v49 = vperm.slane %v519_v39, 0 }
  0x9e   : > { %v641_v43 = vmul.f32 %v595_v31, %v595_v31 }
  0x9f   : > { %4426 = vset.pattern.permute.xlu1 %v4852_v1 }
  0xa0   : > { %v687_v50 = vmul.f32 -0.5, %v641_v43 }
  0xa1   : > { %v282_v51 = vpop.permute.xlu2 %281  ;;  %v236_v55 = vpop.permute.xlu1 %235 }
  0xa2   : > { %v4925_v52 = vpop.eup %4434  ;;  %v585_v21 = vsub.f32 %v236_v55, %v537_v37  ;;  %v790_v37 = vmul.f32 %v743_v28, %v675_v29 }
  0xa3   : > { %931 = vmax.xlane.f32.xlu2 %v4925_v52  ;;  %v4929_v56 = vpop.permute.xlu0 %365 }
  0xa4   : > { %v631_v33 = vmul.f32 %v585_v21, %v585_v21  ;;  %v837_v53 = vmul.f32 1.442695, %v790_v37 }
  0xa6   : > { %v677_v46 = vmul.f32 -0.5, %v631_v33 }
  0xa9   : > { %v295_v57 = vpop.permute.xlu2 %294 }
  0xaa   : > { %v594_v59 = vsub.f32 %v295_v57, %v542_v54  ;;  %v592_v54 = vsub.f32 %v282_v51, %v541_v36  ;;  %v792_v57 = vmul.f32 %v4914_v42, %v677_v46  ;;  %v802_v51 = vmul.f32 %v749_v0, %v687_v50 }
  0xab   : > { %v4935_v13 = vpop.permute.xlu0 %430 }
  0xac   : > { %v640_v61 = vmul.f32 %v594_v59, %v594_v59  ;;  %v726_v59 = vrot.slane %v4905_v27, 4  ;;  %v638_v7 = vmul.f32 %v592_v54, %v592_v54  ;;  %v841_v42 = vmul.f32 1.442695, %v792_v57 }
  0xad   : > { %v315_v54 = vperm.slane %v4872_v8, 0  ;;  %v380_v57 = vperm.slane %v4872_v8, 5 }
  0xae   : > { %v686_v1 = vmul.f32 -0.5, %v640_v61  ;;  %v747_v11 = vperm.slane %v726_v59, 0  ;;  %v684_v21 = vmul.f32 -0.5, %v638_v7 }
  0xb0   : > { %v801_v5 = vmul.f32 %v749_v0, %v686_v1  ;;  %v727_v1 = vrot.slane %v4905_v27, 5 }
  0xb1   : > { %v256_v9 = vpop.permute.xlu1 %255 }
  0xb2   : > { %v588_v12 = vsub.f32 %v256_v9, %v539_v4  ;;  %v859_v14 = vmul.f32 1.442695, %v801_v5  ;;  %v861_v4 = vmul.f32 1.442695, %v802_v51  ;;  %v748_v18 = vperm.slane %v727_v1, 0 }
  0xb4   : > { %v634_v15 = vmul.f32 %v588_v12, %v588_v12  ;;  %4436 = vpow2.f32 %v859_v14  ;;  %v799_v33 = vmul.f32 %v748_v18, %v684_v21 }
  0xb6   : > { %v680_v23 = vmul.f32 -0.5, %v634_v15  ;;  %v635_v15 = vmul.f32 %v589_v62, %v589_v62  ;;  %v445_v62 = vperm.slane %v4875_v10, 2 }
  0xb8   : > { %v795_v25 = vmul.f32 %v4937_v19, %v680_v23 }
  0xba   : > { %v847_v34 = vmul.f32 1.442695, %v795_v25  ;;  %v4943_v45 = vpop.eup %4436  ;;  %v681_v25 = vmul.f32 -0.5, %v635_v15 }
  0xbb   : > { %v217_v35 = vpop.permute.xlu0 %216 }
  0xbc   : > { %v582_v38 = vsub.f32 %v217_v35, %v536_v63  ;;  %4438 = vpow2.f32 %v847_v34  ;;  %v796_v35 = vmul.f32 %v4937_v19, %v681_v25 }
  0xbd   : > { %4440 = vpow2.f32 %v845_v40  ;;  %v855_v40 = vmul.f32 1.442695, %v799_v33 }
  0xbe   : > { %v628_v48 = vmul.f32 %v582_v38, %v582_v38  ;;  %4442 = vpow2.f32 %v837_v53  ;;  %v849_v37 = vmul.f32 1.442695, %v796_v35 }
  0xc0   : > { %v674_v30 = vmul.f32 -0.5, %v628_v48 }
  0xc1   : > { %951 = vmax.xlane.f32.xlu1 %v4943_v45  ;;  %v275_v55 = vpop.permute.xlu1 %274 }
  0xc2   : > { %v789_v58 = vmul.f32 %v743_v28, %v674_v30  ;;  %v591_v60 = vsub.f32 %v275_v55, %v540_v49  ;;  %v4948_v61 = vpop.eup %4438  ;;  %v367_v55 = vperm.slane %v4872_v8, 4 }
  0xc3   : > { %v269_v63 = vpop.permute.xlu0 %268  ;;  %939 = vmax.xlane.f32.xlu2 %v4948_v61  ;;  %v4953_v14 = vpop.eup %4440 }
  0xc4   : > { %v835_v5 = vmul.f32 1.442695, %v789_v58  ;;  %v637_v6 = vmul.f32 %v591_v60, %v591_v60  ;;  %v590_v9 = vsub.f32 %v269_v63, %v540_v49  ;;  %v4956_v0 = vpop.eup %4442  ;;  %v347_v58 = vpop.permute.xlu2 %346  ;;  %v432_v60 = vperm.slane %v4875_v10, 1 }
  0xc5   : > { %v497_v63 = vperm.slane %v4875_v10, 6 }
  0xc6   : > { %4444 = vpow2.f32 %v835_v5  ;;  %v683_v12 = vmul.f32 -0.5, %v637_v6  ;;  %v636_v16 = vmul.f32 %v590_v9, %v590_v9 }
  0xc7   : > { %4446 = vpow2.f32 %v841_v42  ;;  %v5024_v42 = vld [vmem:[%s6107_s1 + $0x8] sm:$0xff] }
  0xc8   : > { %v798_v47 = vmul.f32 %v747_v11, %v683_v12  ;;  %v682_v23 = vmul.f32 -0.5, %v636_v16  ;;  %4448 = vpow2.f32 %v861_v4 }
  0xc9   : > { %937 = vmax.xlane.f32.xlu1 %v4953_v14  ;;  %v288_v24 = vpop.permute.xlu1 %287 }
  0xca   : > { %v797_v26 = vmul.f32 %v747_v11, %v682_v23  ;;  %v593_v28 = vsub.f32 %v288_v24, %v541_v36  ;;  %v853_v31 = vmul.f32 1.442695, %v798_v47  ;;  %v524_v11 = vrot.slane %v5024_v42, 2 }
  0xcb   : > { %929 = vmax.xlane.f32.xlu2 %v4956_v0  ;;  %v729_v24 = vrot.slane %v4905_v27, 7 }
  0xcc   : > { %v4958_v29 = vpop.eup %4444  ;;  %v851_v34 = vmul.f32 1.442695, %v797_v26  ;;  %v639_v38 = vmul.f32 %v593_v28, %v593_v28  ;;  %v4996_v3 = vpop.permute.xlu2 %359  ;;  %v546_v16 = vperm.slane %v524_v11, 0  ;;  %v523_v11 = vrot.slane %v5024_v42, 1 }
  0xcd   : > { %927 = vmax.xlane.f32.xlu0 %v4958_v29  ;;  %v4963_v39 = vpop.eup %4446  ;;  %v750_v33 = vperm.slane %v729_v24, 0 }
  0xce   : > { %4450 = vpow2.f32 %v851_v34  ;;  %v4966_v36 = vpop.eup %4448  ;;  %v685_v43 = vmul.f32 -0.5, %v639_v38  ;;  %v602_v21 = vsub.f32 %v347_v58, %v546_v16 }
  0xcf   : > { %4452 = vpow2.f32 %v853_v31 }
  0xd0   : > { %4454 = vpow2.f32 %v855_v40  ;;  %v800_v19 = vmul.f32 %v748_v18, %v685_v43 }
  0xd1   : > { %933 = vmax.xlane.f32.xlu1 %v4963_v39  ;;  %4456 = vpow2.f32 %v849_v37 }
  0xd2   : > { %v857_v49 = vmul.f32 1.442695, %v800_v19 }
  0xd3   : > { %953 = vmax.xlane.f32.xlu2 %v4966_v36 }
  0xd4   : > { %v4969_v46 = vpop.eup %4450  ;;  %4458 = vpow2.f32 %v857_v49  ;;  %v5002_v8 = vpop.permute.xlu2 %411 }
  0xd5   : > { %v4971_v48 = vpop.eup %4452  ;;  %943 = vmax.xlane.f32.xlu0 %v4969_v46 }
  0xd6   : > { %v4975_v30 = vpop.eup %4454 }
  0xd7   : > { %6118 = vst [vmem:[#allocation5_spill] sm:$0xff] %v4975_v30  ;;  %v4978_v53 = vpop.eup %4456 }
  0xd9   : > { %945 = vmax.xlane.f32.xlu1 %v4971_v48  ;;  %v308_v59 = vpop.permute.xlu1 %307 }
  0xda   : > { %v4981_v50 = vpop.eup %4458 }
  0xdb   : > { %947 = vmax.xlane.f32.xlu2 %v4975_v30  ;;  %6119 = vst [vmem:[#allocation6_spill] sm:$0xff] %v4981_v50 }
  0xdc   : > { %v5006_v1 = vpop.permute.xlu2 %424 }
  0xdd   : > { %941 = vmax.xlane.f32.xlu0 %v4978_v53 }
  0xe5   : > { %949 = vmax.xlane.f32.xlu0 %v4981_v50 }
  0xf2   : > { %320 = vperm.xlu1 %4426, %v315_v54  }
  0xf3   : > { %313 = vperm.xlu2 %4427, %v302_v17   ;;  %v4998_v17 = vpop.permute.xlu1 %339 }
  0xf9   : > { %333 = vperm.xlu0 %4425, %v328_v22   ;;  %v471_v22 = vperm.slane %v4875_v10, 4 }
  0xfa   : > { %372 = vperm.xlu1 %4426, %v367_v55  }
  0xfb   : > { %326 = vperm.xlu2 %4427, %v315_v54  }
 0x101   : > { %398 = vperm.xlu0 %4425, %v393_v32   ;;  %v484_v32 = vperm.slane %v4875_v10, 5  ;;  %v200_v10 = vld [vmem:[%s6108_s2 + $0x8] sm:$0xff] }
 0x102   : > { %385 = vperm.xlu1 %4426, %v380_v57   ;;  %v203_v7 = vsub.f32 0.0, %v200_v10  ;;  %v525_v10 = vrot.slane %v5024_v42, 3 }
 0x103   : > { %378 = vperm.xlu2 %4427, %v367_v55  }
 0x104   : > { %v207_v12 = vmul.f32 1.442695, %v203_v7 }
 0x106   : > { %4460 = vpow2.f32 %v207_v12 }
 0x109   : > { %463 = vperm.xlu0 %4425, %v458_v41   ;;  %v353_v41 = vpop.permute.xlu1 %352 }
 0x10a   : > { %437 = vperm.xlu1 %4426, %v432_v60   ;;  %v603_v35 = vsub.f32 %v353_v41, %v546_v16 }
 0x10b   : > { %391 = vperm.xlu2 %4427, %v380_v57   ;;  %v5012_v6 = vpop.xlane.xlu2 %935 }
 0x10c   : > { %v5032_v23 = vpop.eup %4460  ;;  %v649_v43 = vmul.f32 %v603_v35, %v603_v35 }
 0x10d   : > { %v731_v26 = vrot.slane %v5032_v23, 2 }
 0x10e   : > { %v695_v57 = vmul.f32 -0.5, %v649_v43 }
 0x10f   : > { %v753_v38 = vperm.slane %v731_v26, 0  ;;  %v544_v26 = vperm.slane %v5024_v42, 0 }
 0x111   : > { %476 = vperm.xlu0 %4425, %v471_v22   ;;  %v5008_v5 = vpop.permute.xlu1 %404 }
 0x112   : > { %450 = vperm.xlu1 %4426, %v445_v62  }
 0x113   : > { %443 = vperm.xlu2 %4427, %v432_v60  }
 0x116   : > { %v5019_v9 = vpop.xlane.xlu2 %931 }
 0x119   : > { %489 = vperm.xlu0 %4425, %v484_v32   ;;  %v5017_v51 = vpop.permute.xlu1 %417 }
 0x11a   : > { %502 = vperm.xlu1 %4426, %v497_v63  }
 0x11b   : > { %456 = vperm.xlu2 %4427, %v445_v62  }
 0x121   : > { %4429 = vset.pattern.permute.xlu0 %v4858_v2  ;;  %v5028_v47 = vpop.permute.xlu1 %469 }
 0x122   : > { %4428 = vset.pattern.permute.xlu1 %v4858_v2  ;;  %v522_v2 = vrot.slane %v4898_v20, 7  ;;  %v648_v20 = vmul.f32 %v602_v21, %v602_v21  ;;  %v547_v21 = vperm.slane %v525_v10, 0 }
 0x123   : > { %508 = vperm.xlu2 %4427, %v497_v63  }
 0x124   : > { %v543_v15 = vperm.slane %v522_v2, 0  ;;  %v694_v40 = vmul.f32 -0.5, %v648_v20  ;;  %v604_v20 = vsub.f32 %v4996_v3, %v547_v21 }
 0x126   : > { %v596_v18 = vsub.f32 %v308_v59, %v543_v15  ;;  %v809_v19 = vmul.f32 %v753_v38, %v694_v40  ;;  %v810_v59 = vmul.f32 %v753_v38, %v695_v57  ;;  %v650_v43 = vmul.f32 %v604_v20, %v604_v20 }
 0x127   : > { %v751_v57 = vperm.slane %v5032_v23, 0 }
 0x128   : > { %v642_v25 = vmul.f32 %v596_v18, %v596_v18  ;;  %v875_v58 = vmul.f32 1.442695, %v809_v19  ;;  %v877_v62 = vmul.f32 1.442695, %v810_v59  ;;  %v732_v59 = vrot.slane %v5032_v23, 3 }
 0x12a   : > { %482 = vperm.xlu1 %4428, %v471_v22   ;;  %v688_v34 = vmul.f32 -0.5, %v642_v25 }
 0x12b   : > { %495 = vperm.xlu2 %4427, %v484_v32  }
 0x12c   : > { %v803_v37 = vmul.f32 %v750_v33, %v688_v34  ;;  %v528_v34 = vrot.slane %v5024_v42, 6 }
 0x12e   : > { %v863_v55 = vmul.f32 1.442695, %v803_v37  ;;  %v550_v19 = vperm.slane %v528_v34, 0 }
 0x130   : > { %4462 = vpow2.f32 %v863_v55 }
 0x131   : > { %4464 = vpow2.f32 %v875_v58 }
 0x132   : > { %4466 = vpow2.f32 %v877_v62 }
 0x134   : > { %v5036_v28 = vpop.xlane.xlu1 %951 }
 0x136   : > { %v5030_v4 = vpop.xlane.xlu2 %939  ;;  %v5052_v63 = vpop.eup %4462 }
 0x137   : > { %6120 = vst [vmem:[#allocation7_spill] sm:$0xff] %v5052_v63  ;;  %v5054_v41 = vpop.eup %4464 }
 0x138   : > { %6121 = vst [vmem:[#allocation8_spill] sm:$0xff] %v5054_v41  ;;  %v5062_v18 = vpop.eup %4466 }
 0x139   : > { %6122 = vst [vmem:[#allocation9_spill] sm:$0xff] %v5062_v18 }
 0x13c   : > { %v5044_v27 = vpop.xlane.xlu1 %937 }
 0x13e   : > { %v5038_v31 = vpop.xlane.xlu2 %929 }
 0x140   : > { %v5040_v49 = vpop.xlane.xlu0 %927 }
 0x144   : > { %v5050_v32 = vpop.xlane.xlu1 %933 }
 0x146   : > { %v5042_v54 = vpop.xlane.xlu2 %953 }
 0x148   : > { %v5048_v22 = vpop.xlane.xlu0 %943 }
 0x14c   : > { %v5064_v24 = vpop.xlane.xlu1 %945 }
 0x14e   : > { %v5046_v60 = vpop.xlane.xlu2 %947 }
 0x150   : > { %v5060_v12 = vpop.xlane.xlu0 %941 }
 0x154   : > { %955 = vmax.xlane.f32.xlu1 %v5052_v63  ;;  %967 = vmax.xlane.f32.xlu2 %v5054_v41 }
 0x156   : > { %v314_v7 = vpop.permute.xlu2 %313 }
 0x157   : > { %v597_v2 = vsub.f32 %v314_v7, %v543_v15  ;;  %v545_v15 = vperm.slane %v523_v11, 0  ;;  %v611_v7 = vsub.f32 %v5008_v5, %v550_v19  ;;  %v730_v11 = vrot.slane %v5032_v23, 1 }
 0x158   : > { %v5073_v62 = vpop.xlane.xlu0 %949 }
 0x159   : > { %v643_v16 = vmul.f32 %v597_v2, %v597_v2  ;;  %v601_v55 = vsub.f32 %v4998_v17, %v545_v15  ;;  %6123 = vst [vmem:[#allocation10_spill] sm:$0xff] %v5073_v62  ;;  %v696_v2 = vmul.f32 -0.5, %v650_v43  ;;  %v752_v43 = vperm.slane %v730_v11, 0 }
 0x15b   : > { %v689_v25 = vmul.f32 -0.5, %v643_v16  ;;  %v647_v16 = vmul.f32 %v601_v55, %v601_v55 }
 0x15c   : > { %969 = vmax.xlane.f32.xlu1 %v5062_v18  ;;  %v657_v18 = vmul.f32 %v611_v7, %v611_v7  ;;  %v527_v7 = vrot.slane %v5024_v42, 5 }
 0x15d   : > { %v804_v35 = vmul.f32 %v750_v33, %v689_v25  ;;  %v693_v55 = vmul.f32 -0.5, %v647_v16 }
 0x15e   : > { %v327_v38 = vpop.permute.xlu2 %326 }
 0x15f   : > { %v865_v40 = vmul.f32 1.442695, %v804_v35  ;;  %v599_v37 = vsub.f32 %v327_v38, %v544_v26  ;;  %v754_v35 = vperm.slane %v732_v59, 0  ;;  %v605_v38 = vsub.f32 %v4929_v56, %v547_v21 }
 0x160   : > { %v703_v56 = vmul.f32 -0.5, %v657_v18  ;;  %v808_v62 = vmul.f32 %v752_v43, %v693_v55 }
 0x161   : > { %4468 = vpow2.f32 %v865_v40  ;;  %v645_v58 = vmul.f32 %v599_v37, %v599_v37  ;;  %v526_v37 = vrot.slane %v5024_v42, 4 }
 0x163   : > { %v691_v3 = vmul.f32 -0.5, %v645_v58  ;;  %v735_v58 = vrot.slane %v5032_v23, 6 }
 0x164   : > { %v321_v10 = vpop.permute.xlu1 %320 }
 0x165   : > { %v598_v33 = vsub.f32 %v321_v10, %v544_v26  ;;  %v806_v25 = vmul.f32 %v751_v57, %v691_v3  ;;  %v811_v26 = vmul.f32 %v754_v35, %v696_v2  ;;  %v651_v10 = vmul.f32 %v605_v38, %v605_v38 }
 0x166   : > { %v379_v17 = vpop.permute.xlu2 %378  ;;  %v757_v41 = vperm.slane %v735_v58, 0 }
 0x167   : > { %v644_v20 = vmul.f32 %v598_v33, %v598_v33  ;;  %v5077_v34 = vpop.eup %4468  ;;  %v869_v40 = vmul.f32 1.442695, %v806_v25  ;;  %v548_v33 = vperm.slane %v526_v37, 0  ;;  %v879_v50 = vmul.f32 1.442695, %v811_v26 }
 0x168   : > { %957 = vmax.xlane.f32.xlu0 %v5077_v34  ;;  %v697_v16 = vmul.f32 -0.5, %v651_v10  ;;  %v549_v37 = vperm.slane %v527_v7, 0 }
 0x169   : > { %v690_v5 = vmul.f32 -0.5, %v644_v20  ;;  %4470 = vpow2.f32 %v869_v40  ;;  %v873_v40 = vmul.f32 1.442695, %v808_v62  ;;  %v607_v7 = vsub.f32 %v379_v17, %v548_v33 }
 0x16a   : > { %v812_v26 = vmul.f32 %v754_v35, %v697_v16  ;;  %v201_v35 = vld [vmem:[%s6108_s2 + $0x10] sm:$0x7f] }
 0x16b   : > { %v805_v3 = vmul.f32 %v751_v57, %v690_v5  ;;  %v334_v63 = vpop.permute.xlu0 %333  ;;  %v818_v57 = vmul.f32 %v757_v41, %v703_v56 }
 0x16c   : > { %v373_v59 = vpop.permute.xlu1 %372  ;;  %v600_v25 = vsub.f32 %v334_v63, %v545_v15  ;;  %v733_v15 = vrot.slane %v5032_v23, 4 }
 0x16d   : > { %v867_v21 = vmul.f32 1.442695, %v805_v3  ;;  %v606_v30 = vsub.f32 %v373_v59, %v548_v33  ;;  %v893_v55 = vmul.f32 1.442695, %v818_v57 }
 0x16e   : > { %v646_v20 = vmul.f32 %v600_v25, %v600_v25  ;;  %v392_v2 = vpop.permute.xlu2 %391  ;;  %v881_v25 = vmul.f32 1.442695, %v812_v26 }
 0x16f   : > { %4472 = vpow2.f32 %v867_v21  ;;  %v5084_v11 = vpop.eup %4470  ;;  %v652_v18 = vmul.f32 %v606_v30, %v606_v30  ;;  %v609_v56 = vsub.f32 %v392_v2, %v549_v37  ;;  %v734_v2 = vrot.slane %v5032_v23, 5 }
 0x170   : > { %v692_v38 = vmul.f32 -0.5, %v646_v20  ;;  %961 = vmax.xlane.f32.xlu2 %v5084_v11  ;;  %4474 = vpow2.f32 %v879_v50 }
 0x171   : > { %4476 = vpow2.f32 %v873_v40  ;;  %v698_v10 = vmul.f32 -0.5, %v652_v18  ;;  %v655_v16 = vmul.f32 %v609_v56, %v609_v56  ;;  %v204_v18 = vsub.f32 0.0, %v201_v35 }
 0x172   : > { %v807_v63 = vmul.f32 %v752_v43, %v692_v38  ;;  %v755_v43 = vperm.slane %v733_v15, 0  ;;  %v756_v33 = vperm.slane %v734_v2, 0 }
 0x173   : > { %v399_v58 = vpop.permute.xlu0 %398 }
 0x174   : > { %v871_v3 = vmul.f32 1.442695, %v807_v63  ;;  %v610_v59 = vsub.f32 %v399_v58, %v550_v19  ;;  %v386_v21 = vpop.permute.xlu1 %385  ;;  %v813_v20 = vmul.f32 %v755_v43, %v698_v10  ;;  %v1023_v58 = vsub.f32 %v4916_v44, %v5012_v6 }
 0x175   : > { %v5088_v5 = vpop.eup %4472  ;;  %v608_v38 = vsub.f32 %v386_v21, %v549_v37  ;;  %v529_v37 = vrot.slane %v5024_v42, 7  ;;  %v209_v44 = vmul.f32 1.442695, %v204_v18 }
 0x176   : > { %959 = vmax.xlane.f32.xlu0 %v5088_v5  ;;  %4478 = vpow2.f32 %v871_v3  ;;  %v656_v50 = vmul.f32 %v610_v59, %v610_v59  ;;  %v5091_v62 = vpop.permute.xlu2 %443  ;;  %v5093_v30 = vpop.eup %4474  ;;  %v883_v17 = vmul.f32 1.442695, %v813_v20  ;;  %v701_v3 = vmul.f32 -0.5, %v655_v16 }
 0x177   : > { %4480 = vpow2.f32 %v893_v55  ;;  %v5100_v40 = vpop.eup %4476  ;;  %v653_v55 = vmul.f32 %v607_v7, %v607_v7  ;;  %v1024_v59 = vsub.f32 %v4953_v14, %v5044_v27  ;;  %v654_v10 = vmul.f32 %v608_v38, %v608_v38  ;;  %v5123_v14 = vld [vmem:[%s6107_s1 + $0x10] sm:$0x7f] }
 0x178   : > { %v702_v19 = vmul.f32 -0.5, %v656_v50  ;;  %971 = vmax.xlane.f32.xlu2 %v5093_v30  ;;  %4482 = vpow2.f32 %v881_v25  ;;  %v1073_v6 = vmul.f32 1.442695, %v1023_v58  ;;  %v816_v21 = vmul.f32 %v756_v33, %v701_v3 }
 0x179   : > { %v699_v50 = vmul.f32 -0.5, %v653_v55  ;;  %v551_v35 = vperm.slane %v529_v37, 0  ;;  %v700_v7 = vmul.f32 -0.5, %v654_v10  ;;  %v534_v2 = vrot.slane %v5123_v14, 5 }
 0x17a   : > { %v817_v57 = vmul.f32 %v757_v41, %v702_v19  ;;  %v1075_v19 = vmul.f32 1.442695, %v1024_v59  ;;  %v736_v55 = vrot.slane %v5032_v23, 7  ;;  %v1021_v37 = vsub.f32 %v4925_v52, %v5019_v9 }
 0x17b   : > { %v5102_v63 = vpop.permute.xlu0 %463  ;;  %v613_v20 = vsub.f32 %v5017_v51, %v551_v35  ;;  %v814_v16 = vmul.f32 %v755_v43, %v699_v50  ;;  %v815_v18 = vmul.f32 %v756_v33, %v700_v7  ;;  %v612_v51 = vsub.f32 %v5002_v8, %v551_v35 }
 0x17c   : > { %v5104_v15 = vpop.eup %4478  ;;  %v891_v26 = vmul.f32 1.442695, %v817_v57  ;;  %v889_v57 = vmul.f32 1.442695, %v816_v21  ;;  %v5131_v38 = vpop.permute.xlu1 %437  ;;  %v557_v43 = vperm.slane %v534_v2, 0  ;;  %v531_v33 = vrot.slane %v5123_v14, 2 }
 0x17d   : > { %963 = vmax.xlane.f32.xlu1 %v5104_v15  ;;  %v5110_v41 = vpop.eup %4480  ;;  %v885_v59 = vmul.f32 1.442695, %v814_v16  ;;  %v887_v10 = vmul.f32 1.442695, %v815_v18  ;;  %v758_v50 = vperm.slane %v736_v55, 0  ;;  %v658_v21 = vmul.f32 %v612_v51, %v612_v51 }
 0x17e   : > { %965 = vmax.xlane.f32.xlu0 %v5100_v40  ;;  %4484 = vpow2.f32 %v891_v26  ;;  %v5115_v56 = vpop.permute.xlu2 %456  ;;  %v5118_v25 = vpop.eup %4482  ;;  %v1069_v7 = vmul.f32 1.442695, %v1021_v37  ;;  %v1020_v52 = vsub.f32 %v4956_v0, %v5038_v31  ;;  %v554_v9 = vperm.slane %v531_v33, 0 }
 0x17f   : > { %4486 = vpow2.f32 %v883_v17  ;;  %v659_v17 = vmul.f32 %v613_v20, %v613_v20  ;;  %v1019_v20 = vsub.f32 %v4958_v29, %v5040_v49 }
 0x180   : > { %985 = vmax.xlane.f32.xlu2 %v5110_v41  ;;  %4488 = vpow2.f32 %v209_v44  ;;  %v1067_v31 = vmul.f32 1.442695, %v1020_v52 }
 0x181   : > { %4490 = vpow2.f32 %v1073_v6  ;;  %v705_v35 = vmul.f32 -0.5, %v659_v17  ;;  %v704_v17 = vmul.f32 -0.5, %v658_v21 }
 0x182   : > { %4492 = vpow2.f32 %v1075_v19 }
 0x183   : > { %v5125_v42 = vpop.permute.xlu0 %476  ;;  %4494 = vpow2.f32 %v889_v57  ;;  %v820_v37 = vmul.f32 %v758_v50, %v705_v35 }
 0x184   : > { %v5127_v27 = vpop.eup %4484  ;;  %4496 = vpow2.f32 %v885_v59  ;;  %v451_v55 = vpop.permute.xlu1 %450  ;;  %v619_v59 = vsub.f32 %v5115_v56, %v554_v9  ;;  %v1022_v56 = vsub.f32 %v4963_v39, %v5050_v32  ;;  %v552_v32 = vperm.slane %v5123_v14, 0 }
 0x185   : > { %973 = vmax.xlane.f32.xlu1 %v5118_v25  ;;  %v5137_v26 = vpop.eup %4486  ;;  %4498 = vpow2.f32 %v887_v10  ;;  %v618_v29 = vsub.f32 %v451_v55, %v554_v9  ;;  %v897_v21 = vmul.f32 1.442695, %v820_v37 }
 0x186   : > { %983 = vmax.xlane.f32.xlu0 %v5127_v27  ;;  %v5135_v58 = vpop.permute.xlu2 %508  ;;  %v5142_v3 = vpop.eup %4488  ;;  %4500 = vpow2.f32 %v1069_v7 }
 0x187   : > { %v741_v44 = vrot.slane %v5142_v3, 5  ;;  %v5148_v6 = vpop.eup %4490  ;;  %4502 = vpow2.f32 %v1067_v31  ;;  %v738_v35 = vrot.slane %v5142_v3, 2  ;;  %v664_v52 = vmul.f32 %v618_v29, %v618_v29 }
 0x188   : > { %975 = vmax.xlane.f32.xlu2 %v5137_v26  ;;  %v5150_v8 = vpop.eup %4492  ;;  %v1032_v29 = vsub.f32 %v4966_v36, %v5042_v54 }
 0x189   : > { %v764_v2 = vperm.slane %v741_v44, 0  ;;  %v5158_v18 = vpop.eup %4494 }
 0x18a   : > { %v5164_v10 = vpop.eup %4496 }
 0x18b   : > { %v490_v23 = vpop.permute.xlu0 %489 }
 0x18c   : > { %v624_v19 = vsub.f32 %v490_v23, %v557_v43  ;;  %v1065_v23 = vmul.f32 1.442695, %v1019_v20 }
 0x18d   : > { %1165 = vadd.xlane.f32.xlu1 %v5148_v6 }
 0x18e   : > { %1167 = vadd.xlane.f32.xlu0 %v5150_v8  ;;  %v670_v16 = vmul.f32 %v624_v19, %v624_v19  ;;  %v496_v57 = vpop.permute.xlu2 %495  ;;  %v5166_v19 = vpop.eup %4498  ;;  %4504 = vpow2.f32 %v1065_v23  ;;  %v615_v23 = vsub.f32 %v4935_v13, %v552_v32  ;;  %v1031_v13 = vsub.f32 %v4943_v45, %v5036_v28 }
 0x18f   : > { %v625_v51 = vsub.f32 %v496_v57, %v557_v43  ;;  %v819_v43 = vmul.f32 %v758_v50, %v704_v17  ;;  %v5175_v9 = vpop.eup %4500  ;;  %v530_v50 = vrot.slane %v5123_v14, 1  ;;  %4506 = vpow2.f32 %v897_v21 }
 0x190   : > { %v716_v0 = vmul.f32 -0.5, %v670_v16  ;;  %981 = vmax.xlane.f32.xlu2 %v5158_v18  ;;  %v665_v16 = vmul.f32 %v619_v59, %v619_v59  ;;  %v761_v57 = vperm.slane %v738_v35, 0  ;;  %v710_v17 = vmul.f32 -0.5, %v664_v52  ;;  %v5181_v37 = vpop.eup %4502 }
 0x191   : > { %v671_v33 = vmul.f32 %v625_v51, %v625_v51  ;;  %v895_v20 = vmul.f32 1.442695, %v819_v43  ;;  %v1071_v51 = vmul.f32 1.442695, %v1022_v56  ;;  %v661_v52 = vmul.f32 %v615_v23, %v615_v23 }
 0x192   : > { %v5162_v49 = vmul.f32 %v764_v2, %v716_v0  ;;  %v711_v55 = vmul.f32 -0.5, %v665_v16  ;;  %v553_v0 = vperm.slane %v530_v50, 0  ;;  %v737_v16 = vrot.slane %v5142_v3, 1 }
 0x193   : > { %v717_v44 = vmul.f32 -0.5, %v671_v33  ;;  %4508 = vpow2.f32 %v895_v20  ;;  %v1091_v50 = vmul.f32 1.442695, %v1032_v29  ;;  %v707_v45 = vmul.f32 -0.5, %v661_v52 }
 0x194   : > { %v5183_v39 = vpop.eup %4504  ;;  %v616_v59 = vsub.f32 %v5131_v38, %v553_v0  ;;  %v826_v33 = vmul.f32 %v761_v57, %v711_v55  ;;  %4510 = vpow2.f32 %v1071_v51  ;;  %v614_v38 = vsub.f32 %v5006_v1, %v552_v32 }
 0x195   : > { %v5169_v7 = vmul.f32 %v764_v2, %v717_v44  ;;  %977 = vmax.xlane.f32.xlu1 %v5164_v10  ;;  %v1025_v2 = vsub.f32 %v4948_v61, %v5030_v4  ;;  %v825_v61 = vmul.f32 %v761_v57, %v710_v17  ;;  %v5189_v4 = vpop.eup %4506  ;;  %v1026_v1 = vsub.f32 %v4978_v53, %v5060_v12 }
 0x196   : > { %979 = vmax.xlane.f32.xlu0 %v5166_v19  ;;  %v662_v44 = vmul.f32 %v616_v59, %v616_v59  ;;  %v909_v43 = vmul.f32 1.442695, %v826_v33  ;;  %v660_v36 = vmul.f32 %v614_v38, %v614_v38  ;;  %v760_v57 = vperm.slane %v737_v16, 0 }
 0x197   : > { %v1077_v31 = vmul.f32 1.442695, %v1025_v2  ;;  %v907_v21 = vmul.f32 1.442695, %v825_v61  ;;  %v532_v2 = vrot.slane %v5123_v14, 3  ;;  %v759_v55 = vperm.slane %v5142_v3, 0 }
 0x198   : > { %1161 = vadd.xlane.f32.xlu2 %v5175_v9  ;;  %v708_v20 = vmul.f32 -0.5, %v662_v44  ;;  %v1089_v28 = vmul.f32 1.442695, %v1031_v13  ;;  %v706_v17 = vmul.f32 -0.5, %v660_v36  ;;  %v1079_v32 = vmul.f32 1.442695, %v1026_v1 }
 0x199   : > { %4512 = vpow2.f32 %v1077_v31  ;;  %v5196_v35 = vpop.eup %4508  ;;  %v617_v31 = vsub.f32 %v5091_v62, %v553_v0  ;;  %v555_v53 = vperm.slane %v532_v2, 0  ;;  %v822_v33 = vmul.f32 %v759_v55, %v707_v45 }
 0x19a   : > { %v5199_v56 = vpop.eup %4510  ;;  %4514 = vpow2.f32 %v909_v43  ;;  %v823_v51 = vmul.f32 %v760_v57, %v708_v20  ;;  %v535_v29 = vrot.slane %v5123_v14, 6  ;;  %v821_v44 = vmul.f32 %v759_v55, %v706_v17 }
 0x19b   : > { %4516 = vpow2.f32 %v907_v21  ;;  %v620_v61 = vsub.f32 %v5102_v63, %v555_v53  ;;  %v663_v43 = vmul.f32 %v617_v31, %v617_v31  ;;  %v901_v0 = vmul.f32 1.442695, %v822_v33 }
 0x19c   : > { %4518 = vpow2.f32 %v1091_v50  ;;  %v903_v23 = vmul.f32 1.442695, %v823_v51  ;;  %v1028_v38 = vsub.f32 %v4971_v48, %v5064_v24  ;;  %v558_v63 = vperm.slane %v535_v29, 0 }
 0x19d   : > { %1157 = vadd.xlane.f32.xlu1 %v5183_v39  ;;  %4520 = vpow2.f32 %v1089_v28  ;;  %v666_v21 = vmul.f32 %v620_v61, %v620_v61  ;;  %v899_v16 = vmul.f32 1.442695, %v821_v44  ;;  %v709_v52 = vmul.f32 -0.5, %v663_v43  ;;  %v503_v28 = vpop.permute.xlu1 %502  ;;  %v6125_v43 = vld [vmem:[#allocation10_spill] sm:$0xff] }
 0x19e   : > { %1159 = vadd.xlane.f32.xlu0 %v5181_v37  ;;  %4522 = vpow2.f32 %v1079_v32  ;;  %v739_v50 = vrot.slane %v5142_v3, 3  ;;  %v1027_v36 = vsub.f32 %v4969_v46, %v5048_v22  ;;  %v1083_v1 = vmul.f32 1.442695, %v1028_v38 }
 0x19f   : > { %v5207_v54 = vpop.eup %4512  ;;  %4524 = vpow2.f32 %v903_v23  ;;  %v712_v2 = vmul.f32 -0.5, %v666_v21  ;;  %v627_v55 = vsub.f32 %v5135_v58, %v558_v63  ;;  %v824_v48 = vmul.f32 %v760_v57, %v709_v52  ;;  %v6124_v23 = vld [vmem:[#allocation5_spill] sm:$0xff] }
 0x1a0   : > { %989 = vmax.xlane.f32.xlu2 %v5189_v4  ;;  %v5213_v59 = vpop.eup %4514  ;;  %4526 = vpow2.f32 %v901_v0  ;;  %v762_v45 = vperm.slane %v739_v50, 0  ;;  %v621_v51 = vsub.f32 %v5028_v47, %v555_v53  ;;  %v1081_v17 = vmul.f32 1.442695, %v1027_v36  ;;  %v6126_v0 = vld [vmem:[#allocation6_spill] sm:$0xff] }
 0x1a1   : > { %v5215_v12 = vpop.eup %4516  ;;  %4528 = vpow2.f32 %v899_v16  ;;  %v742_v22 = vrot.slane %v5142_v3, 6  ;;  %v673_v58 = vmul.f32 %v627_v55, %v627_v55  ;;  %v905_v32 = vmul.f32 1.442695, %v824_v48 }
 0x1a2   : > { %v5221_v62 = vpop.eup %4518  ;;  %4530 = vpow2.f32 %v1083_v1  ;;  %v827_v46 = vmul.f32 %v762_v45, %v712_v2  ;;  %v626_v31 = vsub.f32 %v503_v28, %v558_v63  ;;  %v667_v57 = vmul.f32 %v621_v51, %v621_v51 }
 0x1a3   : > { %v5226_v13 = vpop.eup %4520  ;;  %4532 = vpow2.f32 %v1081_v17  ;;  %v1029_v29 = vsub.f32 %v6124_v23, %v5046_v60  ;;  %v765_v53 = vperm.slane %v742_v22, 0  ;;  %v719_v44 = vmul.f32 -0.5, %v673_v58  ;;  %v6127_v23 = vld [vmem:[#allocation8_spill] sm:$0xff] }
 0x1a4   : > { %v5229_v20 = vpop.eup %4522  ;;  %v911_v47 = vmul.f32 1.442695, %v827_v46  ;;  %v1030_v38 = vsub.f32 %v6126_v0, %v6125_v43  ;;  %4534 = vpow2.f32 %v905_v32  ;;  %v672_v21 = vmul.f32 %v626_v31, %v626_v31 }
 0x1a5   : > { %1163 = vadd.xlane.f32.xlu1 %v5199_v56  ;;  %v5236_v24 = vpop.eup %4524  ;;  %v533_v16 = vrot.slane %v5123_v14, 4  ;;  %v713_v52 = vmul.f32 -0.5, %v667_v57  ;;  %v1085_v60 = vmul.f32 1.442695, %v1029_v29  ;;  %v834_v50 = vmul.f32 %v765_v53, %v719_v44  ;;  %v483_v36 = vpop.permute.xlu1 %482 }
 0x1a6   : > { %987 = vmax.xlane.f32.xlu0 %v5196_v35  ;;  %v5241_v33 = vpop.eup %4526  ;;  %4536 = vpow2.f32 %v911_v47  ;;  %v1087_v2 = vmul.f32 1.442695, %v1030_v38  ;;  %v718_v55 = vmul.f32 -0.5, %v672_v21  ;;  %v740_v44 = vrot.slane %v5142_v3, 4  ;;  %v6128_v38 = vld [vmem:[#allocation7_spill] sm:$0xff]  ;;  %v4210_v3 = vld [vmem:[%s6109_s3 + $0xb8] sm:$0xff] }
 0x1a7   : > { %v5243_v61 = vpop.eup %4528  ;;  %v556_v48 = vperm.slane %v533_v16, 0  ;;  %v828_v51 = vmul.f32 %v762_v45, %v713_v52  ;;  %4538 = vpow2.f32 %v1085_v60  ;;  %v925_v17 = vmul.f32 1.442695, %v834_v50  ;;  %1945 = vmatpush.bf16.msra.mxu2 %v4210_v3 }
 0x1a8   : > { %1169 = vadd.xlane.f32.xlu2 %v5207_v54  ;;  %v5251_v63 = vpop.eup %4530  ;;  %4540 = vpow2.f32 %v1087_v2  ;;  %v833_v14 = vmul.f32 %v765_v53, %v718_v55  ;;  %v763_v52 = vperm.slane %v740_v44, 0  ;;  %v4207_v44 = vld [vmem:[%s6109_s3 + $0xa0] sm:$0xff]  ;;  %v919_v3 = vmul.f32 1.442695, %v5162_v49 }
 0x1a9   : > { %v5255_v1 = vpop.eup %4532  ;;  %v623_v46 = vsub.f32 %v483_v36, %v556_v48  ;;  %v913_v32 = vmul.f32 1.442695, %v828_v51  ;;  %4542 = vpow2.f32 %v925_v17  ;;  %v622_v51 = vsub.f32 %v5125_v42, %v556_v48  ;;  %v4209_v17 = vld [vmem:[%s6109_s3 + $0xb0] sm:$0xff]  ;;  %v4208_v42 = vld [vmem:[%s6109_s3 + $0xa8] sm:$0xff] }
 0x1aa   : > { %v5257_v28 = vpop.eup %4534  ;;  %v923_v29 = vmul.f32 1.442695, %v833_v14  ;;  %v6129_v14 = vld [vmem:[#allocation9_spill] sm:$0xff] }
 0x1ab   : > { %v669_v31 = vmul.f32 %v623_v46, %v623_v46  ;;  %4544 = vpow2.f32 %v913_v32  ;;  %1946 = vmatpush.bf16.msra.mxu2 %v4209_v17 }
 0x1ac   : > { %v5261_v22 = vpop.eup %4536  ;;  %4546 = vpow2.f32 %v923_v29 }
 0x1ad   : > { %999 = vmax.xlane.f32.xlu1 %v5215_v12  ;;  %v5265_v47 = vpop.eup %4538  ;;  %v715_v53 = vmul.f32 -0.5, %v669_v31  ;;  %v668_v31 = vmul.f32 %v622_v51, %v622_v51  ;;  %v4205_v51 = vld [vmem:[%s6109_s3 + $0x90] sm:$0xff] }
 0x1ae   : > { %1001 = vmax.xlane.f32.xlu0 %v5213_v59  ;;  %v5268_v43 = vpop.eup %4540 }
 0x1af   : > { %v5273_v16 = vpop.eup %4542  ;;  %v830_v60 = vmul.f32 %v763_v52, %v715_v53  ;;  %1947 = vmatpush.bf16.msra.mxu2 %v4208_v42 }
 0x1b0   : > { %1183 = vadd.xlane.f32.xlu2 %v5221_v62 }
 0x1b1   : > { %v5279_v36 = vpop.eup %4544  ;;  %v917_v46 = vmul.f32 1.442695, %v830_v60 }
 0x1b2   : > { %v5281_v55 = vpop.eup %4546 }
 0x1b3   : > { %1948 = vmatpush.bf16.msra.mxu2 %v4207_v44  ;;  %v921_v44 = vmul.f32 1.442695, %v5169_v7  ;;  %v4200_v7 = vld [vmem:[%s6109_s3 + $0x68] sm:$0xff] }
 0x1b5   : > { %1171 = vadd.xlane.f32.xlu1 %v5229_v20 }
 0x1b6   : > { %1181 = vadd.xlane.f32.xlu0 %v5226_v13 }
 0x1b8   : > { %995 = vmax.xlane.f32.xlu2 %v5236_v24 }
 0x1bd   : > { %991 = vmax.xlane.f32.xlu1 %v5243_v61 }
 0x1be   : > { %993 = vmax.xlane.f32.xlu0 %v5241_v33 }
 0x1c0   : > { %1175 = vadd.xlane.f32.xlu2 %v5251_v63 }
 0x1c5   : > { %997 = vmax.xlane.f32.xlu1 %v5257_v28 }
 0x1c6   : > { %1173 = vadd.xlane.f32.xlu0 %v5255_v1 }
 0x1c7   : > { %v968_v58 = vpop.xlane.xlu2 %967  ;;  %v956_v57 = vpop.xlane.xlu1 %955 }
 0x1c8   : > { %1003 = vmax.xlane.f32.xlu2 %v5261_v22  ;;  %v1039_v45 = vsub.f32 %v6127_v23, %v968_v58  ;;  %v1033_v21 = vsub.f32 %v6128_v38, %v956_v57 }
 0x1ca   : > { %v1105_v0 = vmul.f32 1.442695, %v1039_v45  ;;  %v1093_v50 = vmul.f32 1.442695, %v1033_v21  ;;  %v714_v45 = vmul.f32 -0.5, %v668_v31  ;;  %v4194_v21 = vld [vmem:[%s6109_s3 + $0x38] sm:$0xff] }
 0x1cb   : > { %1809 = vmatpush.bf16.msra.mxu0 %v4194_v21  ;;  %v4204_v31 = vld [vmem:[%s6109_s3 + $0x88] sm:$0xff] }
 0x1cc   : > { %4548 = vpow2.f32 %v1105_v0  ;;  %v829_v38 = vmul.f32 %v763_v52, %v714_v45  ;;  %v4193_v52 = vld [vmem:[%s6109_s3 + $0x30] sm:$0xff] }
 0x1cd   : > { %1177 = vadd.xlane.f32.xlu1 %v5265_v47  ;;  %4550 = vpow2.f32 %v1093_v50  ;;  %v4201_v45 = vld [vmem:[%s6109_s3 + $0x70] sm:$0xff] }
 0x1ce   : > { %1179 = vadd.xlane.f32.xlu0 %v5268_v43  ;;  %4552 = vpow2.f32 %v917_v46  ;;  %v4202_v46 = vld [vmem:[%s6109_s3 + $0x78] sm:$0xff] }
 0x1cf   : > { %v970_v2 = vpop.xlane.xlu1 %969  ;;  %1810 = vmatpush.bf16.msra.mxu0 %v4193_v52  ;;  %1877 = vmatpush.bf16.msra.mxu1 %v4202_v46 }
 0x1d0   : > { %1017 = vmax.xlane.f32.xlu2 %v5273_v16  ;;  %v1040_v58 = vsub.f32 %v6129_v14, %v970_v2  ;;  %v915_v2 = vmul.f32 1.442695, %v829_v38 }
 0x1d2   : > { %v5290_v32 = vpop.eup %4548  ;;  %v1107_v48 = vmul.f32 1.442695, %v1040_v58  ;;  %v4192_v58 = vld [vmem:[%s6109_s3 + $0x28] sm:$0xff] }
 0x1d3   : > { %v5296_v23 = vpop.eup %4550  ;;  %1811 = vmatpush.bf16.msra.mxu0 %v4192_v58  ;;  %1878 = vmatpush.bf16.msra.mxu1 %v4201_v45  ;;  %v4188_v45 = vld [vmem:[%s6109_s3 + $0x8] sm:$0xff] }
 0x1d4   : > { %4554 = vpow2.f32 %v1107_v48  ;;  %v5303_v0 = vpop.eup %4552 }
 0x1d5   : > { %1005 = vmax.xlane.f32.xlu1 %v5279_v36 }
 0x1d6   : > { %1015 = vmax.xlane.f32.xlu0 %v5281_v55 }
 0x1d7   : > { %1879 = vmatpush.bf16.msra.mxu1 %v4200_v7 }
 0x1d8   : > { %1197 = vadd.xlane.f32.xlu2 %v5290_v32 }
 0x1da   : > { %v5313_v50 = vpop.eup %4554 }
 0x1db   : > { %v958_v57 = vpop.xlane.xlu0 %957 }
 0x1dc   : > { %v1034_v29 = vsub.f32 %v5077_v34, %v958_v57  ;;  %v4206_v34 = vld [vmem:[%s6109_s3 + $0x98] sm:$0xff] }
 0x1dd   : > { %1185 = vadd.xlane.f32.xlu1 %v5296_v23  ;;  %1949 = vmatpush.bf16.msra.mxu2 %v4206_v34 }
 0x1de   : > { %v1095_v53 = vmul.f32 1.442695, %v1034_v29 }
 0x1e0   : > { %4556 = vpow2.f32 %v1095_v53  ;;  %1009 = vmax.xlane.f32.xlu2 %v5303_v0  ;;  %v4191_v53 = vld [vmem:[%s6109_s3 + $0x20] sm:$0xff] }
 0x1e1   : > { %4558 = vpow2.f32 %v919_v3  ;;  %1950 = vmatpush.bf16.msra.mxu2 %v4205_v51  ;;  %1812 = vmatpush.bf16.msra.mxu0 %v4191_v53 }
 0x1e2   : > { %4560 = vpow2.f32 %v915_v2 }
 0x1e3   : > { %v962_v60 = vpop.xlane.xlu2 %961 }
 0x1e4   : > { %v1036_v49 = vsub.f32 %v5084_v11, %v962_v60 }
 0x1e5   : > { %1199 = vadd.xlane.f32.xlu1 %v5313_v50  ;;  %1951 = vmatpush.bf16.msra.mxu2 %v4204_v31 }
 0x1e6   : > { %v5322_v17 = vpop.eup %4556  ;;  %v1099_v42 = vmul.f32 1.442695, %v1036_v49 }
 0x1e7   : > { %1187 = vadd.xlane.f32.xlu0 %v5322_v17  ;;  %v5339_v29 = vpop.eup %4558 }
 0x1e8   : > { %v5350_v21 = vpop.eup %4560 }
 0x1e9   : > { %v960_v14 = vpop.xlane.xlu0 %959 }
 0x1ea   : > { %v1035_v11 = vsub.f32 %v5088_v5, %v960_v14  ;;  %v4203_v5 = vld [vmem:[%s6109_s3 + $0x80] sm:$0xff] }
 0x1eb   : > { %v972_v57 = vpop.xlane.xlu2 %971  ;;  %1952 = vmatpush.bf16.msra.mxu2 %v4203_v5  ;;  %v4199_v14 = vld [vmem:[%s6109_s3 + $0x60] sm:$0xff] }
 0x1ec   : > { %v1097_v48 = vmul.f32 1.442695, %v1035_v11  ;;  %v1041_v38 = vsub.f32 %v5093_v30, %v972_v57  ;;  %v4190_v30 = vld [vmem:[%s6109_s3 + $0x18] sm:$0xff]  ;;  %1880 = vmatpush.bf16.msra.mxu1 %v4199_v14  ;;  %v4216_v14 = vld [vmem:[%s6109_s3 + $0xe8] sm:$0xff] }
 0x1ed   : > { %1011 = vmax.xlane.f32.xlu1 %v5339_v29  ;;  %1813 = vmatpush.bf16.msra.mxu0 %v4190_v30  ;;  %v4197_v30 = vld [vmem:[%s6109_s3 + $0x50] sm:$0xff] }
 0x1ee   : > { %4562 = vpow2.f32 %v1097_v48  ;;  %v1109_v60 = vmul.f32 1.442695, %v1041_v38  ;;  %v4218_v48 = vld [vmem:[%s6109_s3 + $0xf8] sm:$0xff] }
 0x1ef   : > { %4564 = vpow2.f32 %v1099_v42  ;;  %1007 = vmax.xlane.f32.xlu0 %v5350_v21  ;;  %v4198_v42 = vld [vmem:[%s6109_s3 + $0x58] sm:$0xff]  ;;  %2013 = vmatpush.bf16.msra.mxu3 %v4218_v48 }
 0x1f0   : > { %4566 = vpow2.f32 %v921_v44  ;;  %v964_v34 = vpop.xlane.xlu1 %963  ;;  %v4242_v44 = vld [vmem:[%s6109_s3 + $0x1b8] sm:$0xff]  ;;  %1881 = vmatpush.bf16.msra.mxu1 %v4198_v42  ;;  %v4240_v42 = vld [vmem:[%s6109_s3 + $0x1a8] sm:$0xff] }
 0x1f1   : > { %v966_v3 = vpop.xlane.xlu0 %965  ;;  %v1037_v2 = vsub.f32 %v5104_v15, %v964_v34  ;;  %v4189_v15 = vld [vmem:[%s6109_s3 + $0x10] sm:$0xff]  ;;  %4568 = vpow2.f32 %v1109_v60  ;;  %2217 = vmatpush.bf16.msrb.mxu2 %v4242_v44 }
 0x1f2   : > { %v1038_v52 = vsub.f32 %v5100_v40, %v966_v3  ;;  %1814 = vmatpush.bf16.msra.mxu0 %v4189_v15  ;;  %v4217_v60 = vld [vmem:[%s6109_s3 + $0xf0] sm:$0xff] }
 0x1f3   : > { %v986_v46 = vpop.xlane.xlu2 %985  ;;  %v1101_v31 = vmul.f32 1.442695, %v1037_v2  ;;  %2014 = vmatpush.bf16.msra.mxu3 %v4217_v60 }
 0x1f4   : > { %v5361_v51 = vpop.eup %4562  ;;  %v1103_v49 = vmul.f32 1.442695, %v1038_v52  ;;  %v1048_v40 = vsub.f32 %v5110_v41, %v986_v46  ;;  %v4241_v52 = vld [vmem:[%s6109_s3 + $0x1b0] sm:$0xff]  ;;  %1882 = vmatpush.bf16.msra.mxu1 %v4197_v30  ;;  %v4196_v46 = vld [vmem:[%s6109_s3 + $0x48] sm:$0xff] }
 0x1f5   : > { %v5366_v58 = vpop.eup %4564  ;;  %1189 = vadd.xlane.f32.xlu2 %v5361_v51  ;;  %2218 = vmatpush.bf16.msrb.mxu2 %v4241_v52  ;;  %v4226_v52 = vld [vmem:[%s6109_s3 + $0x138] sm:$0xff] }
 0x1f6   : > { %1191 = vadd.xlane.f32.xlu1 %v5366_v58  ;;  %v5374_v11 = vpop.eup %4566  ;;  %4570 = vpow2.f32 %v1103_v49  ;;  %v1123_v53 = vmul.f32 1.442695, %v1048_v40  ;;  %1815 = vmatpush.bf16.msra.mxu0 %v4188_v45 }
 0x1f7   : > { %1013 = vmax.xlane.f32.xlu0 %v5374_v11  ;;  %4572 = vpow2.f32 %v1101_v31  ;;  %v5391_v7 = vpop.eup %4568  ;;  %2015 = vmatpush.bf16.msra.mxu3 %v4216_v14 }
 0x1f8   : > { %v974_v57 = vpop.xlane.xlu1 %973  ;;  %4574 = vpow2.f32 %v1123_v53  ;;  %1883 = vmatpush.bf16.msra.mxu1 %v4196_v46  ;;  %v4239_v53 = vld [vmem:[%s6109_s3 + $0x1a0] sm:$0xff]  ;;  %v4238_v46 = vld [vmem:[%s6109_s3 + $0x198] sm:$0xff] }
 0x1f9   : > { %v984_v41 = vpop.xlane.xlu0 %983  ;;  %v1042_v5 = vsub.f32 %v5118_v25, %v974_v57  ;;  %2219 = vmatpush.bf16.msrb.mxu2 %v4240_v42 }
 0x1fa   : > { %v1047_v38 = vsub.f32 %v5127_v27, %v984_v41  ;;  %v4187_v27 = vld [vmem:[%s6109_s3] sm:$0xff] }
 0x1fb   : > { %v976_v3 = vpop.xlane.xlu2 %975  ;;  %v1111_v25 = vmul.f32 1.442695, %v1042_v5  ;;  %1816 = vmatpush.bf16.msra.mxu0 %v4187_v27  ;;  %v4195_v41 = vld [vmem:[%s6109_s3 + $0x40] sm:$0xff] }
 0x1fc   : > { %v1121_v34 = vmul.f32 1.442695, %v1047_v38  ;;  %v5399_v2 = vpop.eup %4570  ;;  %v1043_v31 = vsub.f32 %v5137_v26, %v976_v3  ;;  %v4215_v26 = vld [vmem:[%s6109_s3 + $0xe0] sm:$0xff]  ;;  %1884 = vmatpush.bf16.msra.mxu1 %v4195_v41  ;;  %v4213_v41 = vld [vmem:[%s6109_s3 + $0xd0] sm:$0xff] }
 0x1fd   : > { %1195 = vadd.xlane.f32.xlu2 %v5399_v2  ;;  %v5409_v49 = vpop.eup %4572  ;;  %2016 = vmatpush.bf16.msra.mxu3 %v4215_v26 }
 0x1fe   : > { %1201 = vadd.xlane.f32.xlu1 %v5391_v7  ;;  %4576 = vpow2.f32 %v1121_v34  ;;  %v5422_v48 = vpop.eup %4574  ;;  %v1113_v44 = vmul.f32 1.442695, %v1043_v31  ;;  %v4214_v34 = vld [vmem:[%s6109_s3 + $0xd8] sm:$0xff]  ;;  %2220 = vmatpush.bf16.msrb.mxu2 %v4239_v53 }
 0x1ff   : > { %1193 = vadd.xlane.f32.xlu0 %v5409_v49  ;;  %4578 = vpow2.f32 %v1111_v25  ;;  %2081 = vmatpush.bf16.msrb.mxu0 %v4226_v52 }
 0x200   : > { %v1166_v15 = vpop.xlane.xlu1 %1165 }
 0x201   : > { %v1168_v40 = vpop.xlane.xlu0 %1167  ;;  %4580 = vrcp.f32 %v1166_v15  ;;  %2017 = vmatpush.bf16.msra.mxu3 %v4214_v34  ;;  %v4212_v34 = vld [vmem:[%s6109_s3 + $0xc8] sm:$0xff] }
 0x202   : > { %4582 = vrcp.f32 %v1168_v40  ;;  %2221 = vmatpush.bf16.msrb.mxu2 %v4238_v46 }
 0x203   : > { %v982_v57 = vpop.xlane.xlu2 %981  ;;  %4584 = vpow2.f32 %v1113_v44 }
 0x204   : > { %v5430_v45 = vpop.eup %4576  ;;  %v1046_v30 = vsub.f32 %v5158_v18, %v982_v57 }
 0x205   : > { %1213 = vadd.xlane.f32.xlu2 %v5430_v45  ;;  %v5437_v5 = vpop.eup %4578  ;;  %2018 = vmatpush.bf16.msra.mxu3 %v4213_v41 }
 0x206   : > { %1215 = vadd.xlane.f32.xlu1 %v5422_v48  ;;  %v1119_v26 = vmul.f32 1.442695, %v1046_v30 }
 0x207   : > { %v4581_v38 = vpop.eup %4580  ;;  %1203 = vadd.xlane.f32.xlu0 %v5437_v5 }
 0x208   : > { %v4583_v3 = vpop.eup %4582  ;;  %v978_v60 = vpop.xlane.xlu1 %977  ;;  %v1299_v27 = vmul.f32 %v4581_v38, %v5148_v6 }
 0x209   : > { %v980_v25 = vpop.xlane.xlu0 %979  ;;  %v1044_v14 = vsub.f32 %v5164_v10, %v978_v60  ;;  %v1300_v15 = vmul.f32 %v4583_v3, %v5150_v8  ;;  %v4225_v10 = vld [vmem:[%s6109_s3 + $0x130] sm:$0xff]  ;;  %v5463_v53 = vpop.eup %4584  ;;  %v4224_v60 = vld [vmem:[%s6109_s3 + $0x128] sm:$0xff]  ;;  %2019 = vmatpush.bf16.msra.mxu3 %v4212_v34 }
 0x20a   : > { %v1045_v31 = vsub.f32 %v5166_v19, %v980_v25  ;;  %v1345_v18 = vpack.c.bf16 %v1299_v27, %v1299_v27  ;;  %v4237_v8 = vld [vmem:[%s6109_s3 + $0x190] sm:$0xff]  ;;  %2082 = vmatpush.bf16.msrb.mxu0 %v4225_v10  ;;  %v4234_v25 = vld [vmem:[%s6109_s3 + $0x178] sm:$0xff]  ;;  %v4236_v27 = vld [vmem:[%s6109_s3 + $0x188] sm:$0xff] }
 0x20b   : > { %v1115_v40 = vmul.f32 1.442695, %v1044_v14  ;;  %v1162_v42 = vpop.xlane.xlu2 %1161  ;;  %v1346_v57 = vpack.c.bf16 %v1300_v15, %v1300_v15  ;;  %2222 = vmatpush.bf16.msrb.mxu2 %v4237_v8  ;;  %2149 = vmatpush.bf16.msrb.mxu1 %v4234_v25  ;;  %v4211_v14 = vld [vmem:[%s6109_s3 + $0xc0] sm:$0xff]  ;;  %v4222_v8 = vld [vmem:[%s6109_s3 + $0x118] sm:$0xff] }
 0x20c   : > { %v1117_v6 = vmul.f32 1.442695, %v1045_v31  ;;  %v1893_v44 = vunpack.c.l.b16 %v1345_v18  ;;  %v4223_v18 = vld [vmem:[%s6109_s3 + $0x120] sm:$0xff] }
 0x20d   : > { %4586 = vpow2.f32 %v1115_v40  ;;  %v1894_v19 = vunpack.c.l.b16 %v1346_v57  ;;  %v4233_v40 = vld [vmem:[%s6109_s3 + $0x170] sm:$0xff]  ;;  %2020 = vmatpush.bf16.msra.mxu3 %v4211_v14 }
 0x20e   : > { %4588 = vpow2.f32 %v1117_v6  ;;  %2083 = vmatpush.bf16.msrb.mxu0 %v4224_v60  ;;  %v4235_v6 = vld [vmem:[%s6109_s3 + $0x180] sm:$0xff]  ;;  %v4221_v14 = vld [vmem:[%s6109_s3 + $0x110] sm:$0xff] }
 0x20f   : > { %1205 = vadd.xlane.f32.xlu0 %v5463_v53  ;;  %v1895_v38 = vpack.c.b16 %v1894_v19, %v1893_v44  ;;  %4590 = vpow2.f32 %v1119_v26  ;;  %2223 = vmatpush.bf16.msrb.mxu2 %v4236_v27  ;;  %v4232_v19 = vld [vmem:[%s6109_s3 + $0x168] sm:$0xff] }
 0x210   : > { %v1158_v3 = vpop.xlane.xlu1 %1157  ;;  %2150 = vmatpush.bf16.msrb.mxu1 %v4233_v40 }
 0x211   : > { %v1160_v30 = vpop.xlane.xlu0 %1159  ;;  %4592 = vrcp.f32 %v1158_v3  ;;  %1953 = vmatmul.bf16.vlgmr.msra.gmra.mxu2 %v1895_v38 }
 0x212   : > { %4594 = vrcp.f32 %v1160_v30  ;;  %2084 = vmatpush.bf16.msrb.mxu0 %v4223_v18 }
 0x213   : > { %v5478_v52 = vpop.eup %4586  ;;  %4596 = vrcp.f32 %v1162_v42  ;;  %v990_v46 = vpop.xlane.xlu2 %989  ;;  %2224 = vmatpush.bf16.msrb.mxu2 %v4235_v6 }
 0x214   : > { %v5483_v31 = vpop.eup %4588  ;;  %v1050_v15 = vsub.f32 %v5189_v4, %v990_v46  ;;  %1207 = vadd.xlane.f32.xlu2 %v5478_v52  ;;  %2151 = vmatpush.bf16.msrb.mxu1 %v4232_v19 }
 0x215   : > { %1209 = vadd.xlane.f32.xlu1 %v5483_v31  ;;  %v5497_v42 = vpop.eup %4590 }
 0x216   : > { %v1127_v4 = vmul.f32 1.442695, %v1050_v15  ;;  %2085 = vmatpush.bf16.msrb.mxu0 %v4222_v8  ;;  %v4231_v15 = vld [vmem:[%s6109_s3 + $0x160] sm:$0xff] }
 0x217   : > { %v4593_v57 = vpop.eup %4592  ;;  %1211 = vadd.xlane.f32.xlu0 %v5497_v42 }
 0x218   : > { %v4595_v41 = vpop.eup %4594  ;;  %4598 = vpow2.f32 %v1127_v4  ;;  %v1164_v26 = vpop.xlane.xlu1 %1163  ;;  %v1295_v10 = vmul.f32 %v4593_v57, %v5183_v39  ;;  %2152 = vmatpush.bf16.msrb.mxu1 %v4231_v15  ;;  %v4250_v15 = vld [vmem:[%s6109_s3 + $0x1f8] sm:$0xff] }
 0x219   : > { %v988_v44 = vpop.xlane.xlu0 %987  ;;  %v4597_v38 = vpop.eup %4596  ;;  %4600 = vrcp.f32 %v1164_v26  ;;  %v1296_v3 = vmul.f32 %v4595_v41, %v5181_v37  ;;  %v4220_v41 = vld [vmem:[%s6109_s3 + $0x108] sm:$0xff]  ;;  %v4230_v26 = vld [vmem:[%s6109_s3 + $0x158] sm:$0xff]  ;;  %2285 = vmatpush.bf16.msrb.mxu3 %v4250_v15 }
 0x21a   : > { %v1049_v34 = vsub.f32 %v5196_v35, %v988_v44  ;;  %v1341_v30 = vpack.c.bf16 %v1295_v10, %v1295_v10  ;;  %v1297_v46 = vmul.f32 %v4597_v38, %v5175_v9  ;;  %2086 = vmatpush.bf16.msrb.mxu0 %v4221_v14 }
 0x21b   : > { %v1170_v25 = vpop.xlane.xlu2 %1169  ;;  %v1342_v39 = vpack.c.bf16 %v1296_v3, %v1296_v3 }
 0x21c   : > { %v1125_v60 = vmul.f32 1.442695, %v1049_v34  ;;  %v1757_v27 = vunpack.c.l.b16 %v1341_v30  ;;  %v1343_v57 = vpack.c.bf16 %v1297_v46, %v1297_v46  ;;  %2153 = vmatpush.bf16.msrb.mxu1 %v4230_v26  ;;  %v4228_v46 = vld [vmem:[%s6109_s3 + $0x148] sm:$0xff] }
 0x21d   : > { %v1758_v35 = vunpack.c.l.b16 %v1342_v39 }
 0x21e   : > { %4602 = vpow2.f32 %v1125_v60  ;;  %v5516_v37 = vpop.eup %4598  ;;  %2087 = vmatpush.bf16.msrb.mxu0 %v4220_v41  ;;  %v1825_v3 = vunpack.c.l.b16 %v1343_v57  ;;  %v4227_v41 = vld [vmem:[%s6109_s3 + $0x140] sm:$0xff] }
 0x21f   : > { %v4601_v18 = vpop.eup %4600  ;;  %1219 = vadd.xlane.f32.xlu1 %v5516_v37  ;;  %v1759_v40 = vpack.c.b16 %v1758_v35, %v1757_v27  ;;  %4604 = vrcp.f32 %v1170_v25  ;;  %v4274_v25 = vld [vmem:[%s6109_s3 + $0x2b8] sm:$0xff] }
 0x220   : > { %v1000_v6 = vpop.xlane.xlu1 %999  ;;  %v1298_v4 = vmul.f32 %v4601_v18, %v5199_v56  ;;  %2489 = vmatpush.bf16.msra.mxu2 %v4274_v25 }
 0x221   : > { %v1002_v9 = vpop.xlane.xlu0 %1001  ;;  %v1055_v44 = vsub.f32 %v5215_v12, %v1000_v6  ;;  %1817 = vmatmul.bf16.vlgmr.msra.gmra.mxu0 %v1759_v40  ;;  %v4219_v12 = vld [vmem:[%s6109_s3 + $0x100] sm:$0xff]  ;;  %v4273_v6 = vld [vmem:[%s6109_s3 + $0x2b0] sm:$0xff] }
 0x222   : > { %v1056_v10 = vsub.f32 %v5213_v59, %v1002_v9  ;;  %v1344_v8 = vpack.c.bf16 %v1298_v4, %v1298_v4  ;;  %v4229_v59 = vld [vmem:[%s6109_s3 + $0x150] sm:$0xff]  ;;  %2088 = vmatpush.bf16.msrb.mxu0 %v4219_v12 }
 0x223   : > { %v1137_v56 = vmul.f32 1.442695, %v1055_v44  ;;  %v1184_v34 = vpop.xlane.xlu2 %1183  ;;  %2154 = vmatpush.bf16.msrb.mxu1 %v4229_v59  ;;  %v4249_v44 = vld [vmem:[%s6109_s3 + $0x1f0] sm:$0xff] }
 0x224   : > { %v5528_v19 = vpop.eup %4602  ;;  %v1139_v38 = vmul.f32 1.442695, %v1056_v10  ;;  %4606 = vrcp.f32 %v1184_v34  ;;  %v1826_v30 = vunpack.c.l.b16 %v1344_v8  ;;  %2490 = vmatpush.bf16.msra.mxu2 %v4273_v6  ;;  %2286 = vmatpush.bf16.msrb.mxu3 %v4249_v44 }
 0x225   : > { %1217 = vadd.xlane.f32.xlu2 %v5528_v19  ;;  %4608 = vpow2.f32 %v1137_v56  ;;  %v4605_v14 = vpop.eup %4604 }
 0x226   : > { %4610 = vpow2.f32 %v1139_v38  ;;  %v1827_v60 = vpack.c.b16 %v1826_v30, %v1825_v3  ;;  %v1301_v57 = vmul.f32 %v4605_v14, %v5207_v54  ;;  %v4272_v54 = vld [vmem:[%s6109_s3 + $0x2a8] sm:$0xff] }
 0x227   : > { %2155 = vmatpush.bf16.msrb.mxu1 %v4228_v46 }
 0x228   : > { %1885 = vmatmul.bf16.vlgmr.msra.gmra.mxu1 %v1827_v60  ;;  %v1172_v39 = vpop.xlane.xlu1 %1171  ;;  %2491 = vmatpush.bf16.msra.mxu2 %v4272_v54  ;;  %v4248_v60 = vld [vmem:[%s6109_s3 + $0x1e8] sm:$0xff] }
 0x229   : > { %v1182_v27 = vpop.xlane.xlu0 %1181  ;;  %4612 = vrcp.f32 %v1172_v39  ;;  %2287 = vmatpush.bf16.msrb.mxu3 %v4248_v60 }
 0x22a   : > { %v4607_v35 = vpop.eup %4606  ;;  %4614 = vrcp.f32 %v1182_v27 }
 0x22b   : > { %v5546_v18 = vpop.eup %4608  ;;  %v996_v40 = vpop.xlane.xlu2 %995  ;;  %v1308_v26 = vmul.f32 %v4607_v35, %v5221_v62  ;;  %2156 = vmatpush.bf16.msrb.mxu1 %v4227_v41  ;;  %v1347_v62 = vpack.c.bf16 %v1301_v57, %v1301_v57  ;;  %v4247_v35 = vld [vmem:[%s6109_s3 + $0x1e0] sm:$0xff]  ;;  %v4258_v57 = vld [vmem:[%s6109_s3 + $0x238] sm:$0xff] }
 0x22c   : > { %v5551_v9 = vpop.eup %4610  ;;  %v1053_v4 = vsub.f32 %v5236_v24, %v996_v40  ;;  %1229 = vadd.xlane.f32.xlu0 %v5546_v18  ;;  %v4270_v41 = vld [vmem:[%s6109_s3 + $0x298] sm:$0xff]  ;;  %2353 = vmatpush.bf16.msra.mxu0 %v4258_v57 }
 0x22d   : > { %1231 = vadd.xlane.f32.xlu2 %v5551_v9  ;;  %v1354_v59 = vpack.c.bf16 %v1308_v26, %v1308_v26  ;;  %2288 = vmatpush.bf16.msrb.mxu3 %v4247_v35  ;;  %v4267_v35 = vld [vmem:[%s6109_s3 + $0x280] sm:$0xff] }
 0x22e   : > { %v1133_v10 = vmul.f32 1.442695, %v1053_v4 }
 0x22f   : > { %v4613_v8 = vpop.eup %4612  ;;  %v2166_v15 = vunpack.c.l.b16 %v1354_v59  ;;  %v4245_v59 = vld [vmem:[%s6109_s3 + $0x1d0] sm:$0xff] }
 0x230   : > { %v4615_v24 = vpop.eup %4614  ;;  %4616 = vpow2.f32 %v1133_v10  ;;  %v992_v56 = vpop.xlane.xlu1 %991  ;;  %v1302_v34 = vmul.f32 %v4613_v8, %v5229_v20  ;;  %v4271_v20 = vld [vmem:[%s6109_s3 + $0x2a0] sm:$0xff]  ;;  %v4246_v8 = vld [vmem:[%s6109_s3 + $0x1d8] sm:$0xff] }
 0x231   : > { %v994_v38 = vpop.xlane.xlu0 %993  ;;  %v1051_v3 = vsub.f32 %v5243_v61, %v992_v56  ;;  %v1307_v12 = vmul.f32 %v4615_v24, %v5226_v13  ;;  %2492 = vmatpush.bf16.msra.mxu2 %v4271_v20  ;;  %2289 = vmatpush.bf16.msrb.mxu3 %v4246_v8  ;;  %v4265_v20 = vld [vmem:[%s6109_s3 + $0x270] sm:$0xff] }
 0x232   : > { %v1052_v30 = vsub.f32 %v5241_v33, %v994_v38  ;;  %v1348_v25 = vpack.c.bf16 %v1302_v34, %v1302_v34  ;;  %v1961_v33 = vunpack.c.l.b16 %v1347_v62  ;;  %v4257_v34 = vld [vmem:[%s6109_s3 + $0x230] sm:$0xff] }
 0x233   : > { %v1129_v39 = vmul.f32 1.442695, %v1051_v3  ;;  %v1176_v46 = vpop.xlane.xlu2 %1175  ;;  %v1353_v14 = vpack.c.bf16 %v1307_v12, %v1307_v12  ;;  %v4266_v12 = vld [vmem:[%s6109_s3 + $0x278] sm:$0xff]  ;;  %2354 = vmatpush.bf16.msra.mxu0 %v4257_v34 }
 0x234   : > { %v1131_v27 = vmul.f32 1.442695, %v1052_v30  ;;  %4618 = vrcp.f32 %v1176_v46  ;;  %v1962_v61 = vunpack.c.l.b16 %v1348_v25  ;;  %2421 = vmatpush.bf16.msra.mxu1 %v4266_v12  ;;  %v4268_v25 = vld [vmem:[%s6109_s3 + $0x288] sm:$0xff] }
 0x235   : > { %4620 = vpow2.f32 %v1129_v39  ;;  %v2165_v13 = vunpack.c.l.b16 %v1353_v14  ;;  %2493 = vmatpush.bf16.msra.mxu2 %v4270_v41  ;;  %2290 = vmatpush.bf16.msrb.mxu3 %v4245_v59  ;;  %v4264_v41 = vld [vmem:[%s6109_s3 + $0x268] sm:$0xff] }
 0x236   : > { %v5580_v40 = vpop.eup %4616  ;;  %4622 = vpow2.f32 %v1131_v27  ;;  %v1963_v6 = vpack.c.b16 %v1962_v61, %v1961_v33  ;;  %v4244_v33 = vld [vmem:[%s6109_s3 + $0x1c8] sm:$0xff] }
 0x237   : > { %1225 = vadd.xlane.f32.xlu2 %v5580_v40  ;;  %v2167_v4 = vpack.c.b16 %v2166_v15, %v2165_v13 }
 0x238   : > { %2021 = vmatmul.bf16.vlgmr.msra.gmra.mxu3 %v1963_v6  ;;  %v998_v26 = vpop.xlane.xlu1 %997  ;;  %2422 = vmatpush.bf16.msra.mxu1 %v4265_v20  ;;  %v4281_v20 = vld [vmem:[%s6109_s3 + $0x2f0] sm:$0xff] }
 0x239   : > { %v1174_v44 = vpop.xlane.xlu0 %1173  ;;  %v1054_v10 = vsub.f32 %v5257_v28, %v998_v26  ;;  %2225 = vmatmul.bf16.vlgmr.msrb.gmra.mxu2 %v2167_v4  ;;  %v4269_v28 = vld [vmem:[%s6109_s3 + $0x290] sm:$0xff]  ;;  %2291 = vmatpush.bf16.msrb.mxu3 %v4244_v33  ;;  %v4243_v26 = vld [vmem:[%s6109_s3 + $0x1c0] sm:$0xff] }
 0x23a   : > { %4624 = vrcp.f32 %v1174_v44  ;;  %v4619_v54 = vpop.eup %4618  ;;  %2494 = vmatpush.bf16.msra.mxu2 %v4269_v28 }
 0x23b   : > { %v5593_v24 = vpop.eup %4620  ;;  %v1135_v56 = vmul.f32 1.442695, %v1054_v10  ;;  %v1004_v38 = vpop.xlane.xlu2 %1003  ;;  %v1304_v30 = vmul.f32 %v4619_v54, %v5251_v63  ;;  %v4256_v63 = vld [vmem:[%s6109_s3 + $0x228] sm:$0xff]  ;;  %v4254_v54 = vld [vmem:[%s6109_s3 + $0x218] sm:$0xff] }
 0x23c   : > { %v5601_v62 = vpop.eup %4622  ;;  %v1057_v3 = vsub.f32 %v5261_v22, %v1004_v38  ;;  %1221 = vadd.xlane.f32.xlu1 %v5593_v24  ;;  %2355 = vmatpush.bf16.msra.mxu0 %v4256_v63 }
 0x23d   : > { %4626 = vpow2.f32 %v1135_v56  ;;  %1223 = vadd.xlane.f32.xlu0 %v5601_v62  ;;  %v1350_v14 = vpack.c.bf16 %v1304_v30, %v1304_v30  ;;  %2423 = vmatpush.bf16.msra.mxu1 %v4264_v41  ;;  %v4306_v56 = vld [vmem:[%s6109_s3 + $0x3b8] sm:$0xff]  ;;  %v4263_v30 = vld [vmem:[%s6109_s3 + $0x260] sm:$0xff] }
 0x23e   : > { %v1141_v60 = vmul.f32 1.442695, %v1057_v3  ;;  %2495 = vmatpush.bf16.msra.mxu2 %v4268_v25  ;;  %2292 = vmatpush.bf16.msrb.mxu3 %v4243_v26 }
 0x23f   : > { %v2030_v57 = vunpack.c.l.b16 %v1350_v14 }
 0x240   : > { %v4625_v22 = vpop.eup %4624  ;;  %4628 = vpow2.f32 %v1141_v60  ;;  %v1178_v39 = vpop.xlane.xlu1 %1177 }
 0x241   : > { %v1180_v27 = vpop.xlane.xlu0 %1179  ;;  %v1303_v46 = vmul.f32 %v4625_v22, %v5255_v1  ;;  %4630 = vrcp.f32 %v1178_v39  ;;  %v4255_v1 = vld [vmem:[%s6109_s3 + $0x220] sm:$0xff]  ;;  %v4282_v22 = vld [vmem:[%s6109_s3 + $0x2f8] sm:$0xff]  ;;  %2424 = vmatpush.bf16.msra.mxu1 %v4263_v30 }
 0x242   : > { %4632 = vrcp.f32 %v1180_v27  ;;  %2356 = vmatpush.bf16.msra.mxu0 %v4255_v1  ;;  %2496 = vmatpush.bf16.msra.mxu2 %v4267_v35  ;;  %v4252_v1 = vld [vmem:[%s6109_s3 + $0x208] sm:$0xff]  ;;  %v4259_v30 = vld [vmem:[%s6109_s3 + $0x240] sm:$0xff] }
 0x243   : > { %v1349_v61 = vpack.c.bf16 %v1303_v46, %v1303_v46  ;;  %v5626_v13 = vpop.eup %4626  ;;  %v1018_v15 = vpop.xlane.xlu2 %1017  ;;  %2557 = vmatpush.bf16.msra.mxu3 %v4282_v22  ;;  %v4262_v46 = vld [vmem:[%s6109_s3 + $0x258] sm:$0xff]  ;;  %v4304_v35 = vld [vmem:[%s6109_s3 + $0x3a8] sm:$0xff] }
 0x244   : > { %v1064_v6 = vsub.f32 %v5273_v16, %v1018_v15  ;;  %1227 = vadd.xlane.f32.xlu1 %v5626_v13 }
 0x245   : > { %v2029_v4 = vunpack.c.l.b16 %v1349_v61  ;;  %2425 = vmatpush.bf16.msra.mxu1 %v4262_v46 }
 0x246   : > { %v5642_v44 = vpop.eup %4628  ;;  %v1155_v10 = vmul.f32 1.442695, %v1064_v6  ;;  %2357 = vmatpush.bf16.msra.mxu0 %v4254_v54  ;;  %2761 = vmatpush.bf16.msrb.mxu2 %v4306_v56  ;;  %v4261_v6 = vld [vmem:[%s6109_s3 + $0x250] sm:$0xff]  ;;  %v4260_v54 = vld [vmem:[%s6109_s3 + $0x248] sm:$0xff] }
 0x247   : > { %v2031_v8 = vpack.c.b16 %v2030_v57, %v2029_v4  ;;  %v4631_v16 = vpop.eup %4630  ;;  %1233 = vadd.xlane.f32.xlu0 %v5642_v44  ;;  %2558 = vmatpush.bf16.msra.mxu3 %v4281_v20  ;;  %v4280_v4 = vld [vmem:[%s6109_s3 + $0x2e8] sm:$0xff] }
 0x248   : > { %v4633_v38 = vpop.eup %4632  ;;  %4634 = vpow2.f32 %v1155_v10  ;;  %v1006_v34 = vpop.xlane.xlu1 %1005  ;;  %v1305_v3 = vmul.f32 %v4631_v16, %v5265_v47  ;;  %v4303_v16 = vld [vmem:[%s6109_s3 + $0x3a0] sm:$0xff]  ;;  %v4300_v20 = vld [vmem:[%s6109_s3 + $0x388] sm:$0xff] }
 0x249   : > { %2089 = vmatmul.bf16.vlgmr.msrb.gmra.mxu0 %v2031_v8  ;;  %v1016_v28 = vpop.xlane.xlu0 %1015  ;;  %v1058_v12 = vsub.f32 %v5279_v36, %v1006_v34  ;;  %v1306_v60 = vmul.f32 %v4633_v38, %v5268_v43  ;;  %v4253_v36 = vld [vmem:[%s6109_s3 + $0x210] sm:$0xff]  ;;  %2426 = vmatpush.bf16.msra.mxu1 %v4261_v6  ;;  %v4251_v8 = vld [vmem:[%s6109_s3 + $0x200] sm:$0xff]  ;;  %v4290_v38 = vld [vmem:[%s6109_s3 + $0x338] sm:$0xff] }
 0x24a   : > { %v1063_v59 = vsub.f32 %v5281_v55, %v1016_v28  ;;  %v1351_v63 = vpack.c.bf16 %v1305_v3, %v1305_v3  ;;  %v4305_v43 = vld [vmem:[%s6109_s3 + $0x3b0] sm:$0xff]  ;;  %2358 = vmatpush.bf16.msra.mxu0 %v4253_v36  ;;  %v4302_v28 = vld [vmem:[%s6109_s3 + $0x398] sm:$0xff] }
 0x24b   : > { %v1143_v25 = vmul.f32 1.442695, %v1058_v12  ;;  %v1198_v39 = vpop.xlane.xlu2 %1197  ;;  %v1352_v27 = vpack.c.bf16 %v1306_v60, %v1306_v60  ;;  %2762 = vmatpush.bf16.msrb.mxu2 %v4305_v43  ;;  %2559 = vmatpush.bf16.msra.mxu3 %v4280_v4  ;;  %v4298_v60 = vld [vmem:[%s6109_s3 + $0x378] sm:$0xff]  ;;  %v4277_v36 = vld [vmem:[%s6109_s3 + $0x2d0] sm:$0xff] }
 0x24c   : > { %v1153_v47 = vmul.f32 1.442695, %v1063_v59  ;;  %v2097_v55 = vunpack.c.l.b16 %v1351_v63  ;;  %v4278_v59 = vld [vmem:[%s6109_s3 + $0x2d8] sm:$0xff]  ;;  %v4289_v63 = vld [vmem:[%s6109_s3 + $0x330] sm:$0xff] }
 0x24d   : > { %4636 = vpow2.f32 %v1143_v25  ;;  %v2098_v14 = vunpack.c.l.b16 %v1352_v27  ;;  %2427 = vmatpush.bf16.msra.mxu1 %v4260_v54 }
 0x24e   : > { %v5673_v33 = vpop.eup %4634  ;;  %4638 = vpow2.f32 %v1153_v47  ;;  %2359 = vmatpush.bf16.msra.mxu0 %v4252_v1  ;;  %v4301_v47 = vld [vmem:[%s6109_s3 + $0x390] sm:$0xff] }
 0x24f   : > { %1247 = vadd.xlane.f32.xlu0 %v5673_v33  ;;  %v2099_v61 = vpack.c.b16 %v2098_v14, %v2097_v55  ;;  %2763 = vmatpush.bf16.msrb.mxu2 %v4304_v35  ;;  %4640 = vrcp.f32 %v1198_v39  ;;  %v4288_v55 = vld [vmem:[%s6109_s3 + $0x328] sm:$0xff] }
 0x250   : > { %v1186_v15 = vpop.xlane.xlu1 %1185 }
 0x251   : > { %2157 = vmatmul.bf16.vlgmr.msrb.gmra.mxu1 %v2099_v61  ;;  %4642 = vrcp.f32 %v1186_v15 }
 0x252   : > { %2360 = vmatpush.bf16.msra.mxu0 %v4251_v8  ;;  %2428 = vmatpush.bf16.msra.mxu1 %v4259_v30 }
 0x253   : > { %v5688_v57 = vpop.eup %4636  ;;  %v1010_v41 = vpop.xlane.xlu2 %1009  ;;  %2764 = vmatpush.bf16.msrb.mxu2 %v4303_v16 }
 0x254   : > { %v5690_v26 = vpop.eup %4638  ;;  %v1060_v10 = vsub.f32 %v5303_v0, %v1010_v41  ;;  %1235 = vadd.xlane.f32.xlu2 %v5688_v57  ;;  %v4279_v0 = vld [vmem:[%s6109_s3 + $0x2e0] sm:$0xff]  ;;  %v4296_v41 = vld [vmem:[%s6109_s3 + $0x368] sm:$0xff] }
 0x255   : > { %1245 = vadd.xlane.f32.xlu1 %v5690_v26  ;;  %2560 = vmatpush.bf16.msra.mxu3 %v4279_v0  ;;  %v4641_v3 = vpop.eup %4640 }
 0x256   : > { %v1147_v56 = vmul.f32 1.442695, %v1060_v10  ;;  %2625 = vmatpush.bf16.msrb.mxu0 %v4290_v38  ;;  %v1315_v25 = vmul.f32 %v4641_v3, %v5290_v32  ;;  %2693 = vmatpush.bf16.msrb.mxu1 %v4298_v60  ;;  %v4297_v32 = vld [vmem:[%s6109_s3 + $0x370] sm:$0xff]  ;;  %v4295_v3 = vld [vmem:[%s6109_s3 + $0x360] sm:$0xff] }
 0x257   : > { %2765 = vmatpush.bf16.msrb.mxu2 %v4302_v28  ;;  %v4643_v22 = vpop.eup %4642 }
 0x258   : > { %4644 = vpow2.f32 %v1147_v56  ;;  %v1200_v34 = vpop.xlane.xlu1 %1199  ;;  %v1309_v27 = vmul.f32 %v4643_v22, %v5296_v23  ;;  %v1361_v46 = vpack.c.bf16 %v1315_v25, %v1315_v25  ;;  %v4299_v56 = vld [vmem:[%s6109_s3 + $0x380] sm:$0xff]  ;;  %v4314_v22 = vld [vmem:[%s6109_s3 + $0x3f8] sm:$0xff] }
 0x259   : > { %4646 = vrcp.f32 %v1200_v34  ;;  %2561 = vmatpush.bf16.msra.mxu3 %v4278_v59  ;;  %v4294_v25 = vld [vmem:[%s6109_s3 + $0x358] sm:$0xff] }
 0x25a   : > { %v1188_v12 = vpop.xlane.xlu0 %1187  ;;  %2626 = vmatpush.bf16.msrb.mxu0 %v4289_v63  ;;  %2694 = vmatpush.bf16.msrb.mxu1 %v4297_v32  ;;  %v1355_v4 = vpack.c.bf16 %v1309_v27, %v1309_v27  ;;  %v2437_v16 = vunpack.c.l.b16 %v1361_v46  ;;  %v4313_v32 = vld [vmem:[%s6109_s3 + $0x3f0] sm:$0xff] }
 0x25b   : > { %4648 = vrcp.f32 %v1188_v12  ;;  %2766 = vmatpush.bf16.msrb.mxu2 %v4301_v47  ;;  %v4286_v12 = vld [vmem:[%s6109_s3 + $0x318] sm:$0xff] }
 0x25c   : > { %v2233_v34 = vunpack.c.l.b16 %v1355_v4 }
 0x25d   : > { %2562 = vmatpush.bf16.msra.mxu3 %v4277_v36  ;;  %v4285_v36 = vld [vmem:[%s6109_s3 + $0x310] sm:$0xff] }
 0x25e   : > { %v5729_v39 = vpop.eup %4644  ;;  %2627 = vmatpush.bf16.msrb.mxu0 %v4288_v55  ;;  %2695 = vmatpush.bf16.msrb.mxu1 %v4296_v41 }
 0x25f   : > { %v4647_v43 = vpop.eup %4646  ;;  %1239 = vadd.xlane.f32.xlu1 %v5729_v39  ;;  %2767 = vmatpush.bf16.msrb.mxu2 %v4300_v20  ;;  %v4284_v20 = vld [vmem:[%s6109_s3 + $0x308] sm:$0xff] }
 0x260   : > { %v1316_v14 = vmul.f32 %v4647_v43, %v5313_v50  ;;  %v1012_v23 = vpop.xlane.xlu1 %1011  ;;  %v4276_v50 = vld [vmem:[%s6109_s3 + $0x2c8] sm:$0xff] }
 0x261   : > { %v4649_v61 = vpop.eup %4648  ;;  %v1061_v15 = vsub.f32 %v5339_v29, %v1012_v23  ;;  %v4287_v29 = vld [vmem:[%s6109_s3 + $0x320] sm:$0xff]  ;;  %2563 = vmatpush.bf16.msra.mxu3 %v4276_v50 }
 0x262   : > { %v1362_v1 = vpack.c.bf16 %v1316_v14, %v1316_v14  ;;  %v1008_v35 = vpop.xlane.xlu0 %1007  ;;  %v1310_v6 = vmul.f32 %v4649_v61, %v5322_v17  ;;  %2628 = vmatpush.bf16.msrb.mxu0 %v4287_v29  ;;  %2696 = vmatpush.bf16.msrb.mxu1 %v4295_v3  ;;  %v4311_v29 = vld [vmem:[%s6109_s3 + $0x3e0] sm:$0xff] }
 0x263   : > { %v1149_v10 = vmul.f32 1.442695, %v1061_v15  ;;  %v1059_v8 = vsub.f32 %v5350_v21, %v1008_v35  ;;  %2768 = vmatpush.bf16.msrb.mxu2 %v4299_v56  ;;  %v4275_v21 = vld [vmem:[%s6109_s3 + $0x2c0] sm:$0xff]  ;;  %v4312_v35 = vld [vmem:[%s6109_s3 + $0x3e8] sm:$0xff] }
 0x264   : > { %v2438_v54 = vunpack.c.l.b16 %v1362_v1  ;;  %v1356_v17 = vpack.c.bf16 %v1310_v6, %v1310_v6  ;;  %v4338_v6 = vld [vmem:[%s6109_s3 + $0x4b8] sm:$0xff]  ;;  %v4291_v56 = vld [vmem:[%s6109_s3 + $0x340] sm:$0xff] }
 0x265   : > { %4650 = vpow2.f32 %v1149_v10  ;;  %v1145_v0 = vmul.f32 1.442695, %v1059_v8  ;;  %2564 = vmatpush.bf16.msra.mxu3 %v4275_v21  ;;  %v4283_v10 = vld [vmem:[%s6109_s3 + $0x300] sm:$0xff]  ;;  %v4336_v21 = vld [vmem:[%s6109_s3 + $0x4a8] sm:$0xff] }
 0x266   : > { %v2439_v38 = vpack.c.b16 %v2438_v54, %v2437_v16  ;;  %v2234_v28 = vunpack.c.l.b16 %v1356_v17  ;;  %2629 = vmatpush.bf16.msrb.mxu0 %v4286_v12  ;;  %2697 = vmatpush.bf16.msrb.mxu1 %v4294_v25  ;;  %v4337_v16 = vld [vmem:[%s6109_s3 + $0x4b0] sm:$0xff] }
 0x267   : > { %4652 = vpow2.f32 %v1145_v0  ;;  %v4309_v25 = vld [vmem:[%s6109_s3 + $0x3d0] sm:$0xff] }
 0x268   : > { %v1190_v30 = vpop.xlane.xlu2 %1189  ;;  %2497 = vmatmul.bf16.vlgmr.msra.gmra.mxu2 %v2439_v38  ;;  %v2235_v60 = vpack.c.b16 %v2234_v28, %v2233_v34  ;;  %v4310_v28 = vld [vmem:[%s6109_s3 + $0x3d8] sm:$0xff] }
 0x269   : > { %v1192_v59 = vpop.xlane.xlu1 %1191  ;;  %4654 = vrcp.f32 %v1190_v30  ;;  %3033 = vmatpush.bf16.msra.mxu2 %v4338_v6 }
 0x26a   : > { %4656 = vrcp.f32 %v1192_v59  ;;  %2293 = vmatmul.bf16.vlgmr.msrb.gmra.mxu3 %v2235_v60  ;;  %v1014_v63 = vpop.xlane.xlu0 %1013  ;;  %2630 = vmatpush.bf16.msrb.mxu0 %v4285_v36 }
 0x26b   : > { %v5776_v47 = vpop.eup %4650  ;;  %v1062_v27 = vsub.f32 %v5374_v11, %v1014_v63  ;;  %2829 = vmatpush.bf16.msrb.mxu3 %v4314_v22  ;;  %v4293_v11 = vld [vmem:[%s6109_s3 + $0x350] sm:$0xff] }
 0x26c   : > { %1241 = vadd.xlane.f32.xlu0 %v5776_v47  ;;  %2698 = vmatpush.bf16.msrb.mxu1 %v4293_v11 }
 0x26d   : > { %v5786_v43 = vpop.eup %4652  ;;  %v1151_v55 = vmul.f32 1.442695, %v1062_v27  ;;  %3034 = vmatpush.bf16.msra.mxu2 %v4337_v16  ;;  %v4330_v16 = vld [vmem:[%s6109_s3 + $0x478] sm:$0xff] }
 0x26e   : > { %1237 = vadd.xlane.f32.xlu2 %v5786_v43  ;;  %2631 = vmatpush.bf16.msrb.mxu0 %v4284_v20 }
 0x26f   : > { %v4655_v46 = vpop.eup %4654  ;;  %4658 = vpow2.f32 %v1151_v55  ;;  %2830 = vmatpush.bf16.msrb.mxu3 %v4313_v32 }
 0x270   : > { %v4657_v14 = vpop.eup %4656  ;;  %v1311_v23 = vmul.f32 %v4655_v46, %v5361_v51  ;;  %v1196_v1 = vpop.xlane.xlu2 %1195 }
 0x271   : > { %v1312_v61 = vmul.f32 %v4657_v14, %v5366_v58  ;;  %v1202_v15 = vpop.xlane.xlu1 %1201  ;;  %4660 = vrcp.f32 %v1196_v1  ;;  %v4292_v58 = vld [vmem:[%s6109_s3 + $0x348] sm:$0xff]  ;;  %3035 = vmatpush.bf16.msra.mxu2 %v4336_v21 }
 0x272   : > { %v1357_v4 = vpack.c.bf16 %v1311_v23, %v1311_v23  ;;  %v1194_v50 = vpop.xlane.xlu0 %1193  ;;  %2699 = vmatpush.bf16.msrb.mxu1 %v4292_v58  ;;  %2632 = vmatpush.bf16.msrb.mxu0 %v4283_v10  ;;  %v4308_v14 = vld [vmem:[%s6109_s3 + $0x3c8] sm:$0xff]  ;;  %v4322_v23 = vld [vmem:[%s6109_s3 + $0x438] sm:$0xff] }
 0x273   : > { %v1358_v51 = vpack.c.bf16 %v1312_v61, %v1312_v61  ;;  %4662 = vrcp.f32 %v1194_v50  ;;  %2831 = vmatpush.bf16.msrb.mxu3 %v4312_v35  ;;  %v4307_v50 = vld [vmem:[%s6109_s3 + $0x3c0] sm:$0xff] }
 0x274   : > { %v2301_v41 = vunpack.c.l.b16 %v1357_v4  ;;  %4664 = vrcp.f32 %v1202_v15 }
 0x275   : > { %v2302_v8 = vunpack.c.l.b16 %v1358_v51  ;;  %v5815_v54 = vpop.eup %4658 }
 0x276   : > { %1243 = vadd.xlane.f32.xlu2 %v5815_v54  ;;  %2700 = vmatpush.bf16.msrb.mxu1 %v4291_v56 }
 0x277   : > { %v2303_v17 = vpack.c.b16 %v2302_v8, %v2301_v41  ;;  %2832 = vmatpush.bf16.msrb.mxu3 %v4311_v29  ;;  %v4661_v0 = vpop.eup %4660 }
 0x278   : > { %v1214_v34 = vpop.xlane.xlu2 %1213  ;;  %v1314_v30 = vmul.f32 %v4661_v0, %v5399_v2  ;;  %v4335_v2 = vld [vmem:[%s6109_s3 + $0x4a0] sm:$0xff]  ;;  %v4320_v0 = vld [vmem:[%s6109_s3 + $0x428] sm:$0xff] }
 0x279   : > { %v1216_v38 = vpop.xlane.xlu1 %1215  ;;  %2361 = vmatmul.bf16.vlgmr.msra.gmra.mxu0 %v2303_v17  ;;  %v4663_v3 = vpop.eup %4662  ;;  %3036 = vmatpush.bf16.msra.mxu2 %v4335_v2  ;;  %v4318_v2 = vld [vmem:[%s6109_s3 + $0x418] sm:$0xff] }
 0x27a   : > { %4666 = vrcp.f32 %v1216_v38  ;;  %v1313_v12 = vmul.f32 %v4663_v3, %v5409_v49  ;;  %v1204_v59 = vpop.xlane.xlu0 %1203  ;;  %v4665_v60 = vpop.eup %4664  ;;  %v1360_v22 = vpack.c.bf16 %v1314_v30, %v1314_v30  ;;  %2897 = vmatpush.bf16.msra.mxu0 %v4322_v23  ;;  %v4332_v38 = vld [vmem:[%s6109_s3 + $0x488] sm:$0xff]  ;;  %v4329_v3 = vld [vmem:[%s6109_s3 + $0x470] sm:$0xff]  ;;  %v4319_v30 = vld [vmem:[%s6109_s3 + $0x420] sm:$0xff] }
 0x27b   : > { %4668 = vrcp.f32 %v1214_v34  ;;  %2833 = vmatpush.bf16.msrb.mxu3 %v4310_v28  ;;  %v1317_v27 = vmul.f32 %v4665_v60, %v5391_v7  ;;  %v4334_v7 = vld [vmem:[%s6109_s3 + $0x498] sm:$0xff]  ;;  %v4317_v23 = vld [vmem:[%s6109_s3 + $0x410] sm:$0xff] }
 0x27c   : > { %4670 = vrcp.f32 %v1204_v59  ;;  %v1359_v63 = vpack.c.bf16 %v1313_v12, %v1313_v12  ;;  %v2370_v36 = vunpack.c.l.b16 %v1360_v22  ;;  %v4331_v12 = vld [vmem:[%s6109_s3 + $0x480] sm:$0xff] }
 0x27d   : > { %v1363_v15 = vpack.c.bf16 %v1317_v27, %v1317_v27  ;;  %3037 = vmatpush.bf16.msra.mxu2 %v4334_v7 }
 0x27e   : > { %v2369_v49 = vunpack.c.l.b16 %v1359_v63  ;;  %v4328_v63 = vld [vmem:[%s6109_s3 + $0x468] sm:$0xff] }
 0x27f   : > { %2834 = vmatpush.bf16.msrb.mxu3 %v4309_v25  ;;  %v2505_v41 = vunpack.c.l.b16 %v1363_v15  ;;  %v4326_v15 = vld [vmem:[%s6109_s3 + $0x458] sm:$0xff] }
 0x280   : > { %v4667_v32 = vpop.eup %4666  ;;  %v2371_v11 = vpack.c.b16 %v2370_v36, %v2369_v49 }
 0x281   : > { %v4669_v55 = vpop.eup %4668  ;;  %v1324_v46 = vmul.f32 %v4667_v32, %v5422_v48 }
 0x282   : > { %v4671_v20 = vpop.eup %4670  ;;  %v1323_v61 = vmul.f32 %v4669_v55, %v5430_v45  ;;  %2429 = vmatmul.bf16.vlgmr.msra.gmra.mxu1 %v2371_v11  ;;  %v1206_v35 = vpop.xlane.xlu0 %1205  ;;  %v4321_v45 = vld [vmem:[%s6109_s3 + $0x430] sm:$0xff]  ;;  %v4327_v11 = vld [vmem:[%s6109_s3 + $0x460] sm:$0xff] }
 0x283   : > { %v1370_v1 = vpack.c.bf16 %v1324_v46, %v1324_v46  ;;  %v1318_v48 = vmul.f32 %v4671_v20, %v5437_v5  ;;  %4672 = vrcp.f32 %v1206_v35  ;;  %2835 = vmatpush.bf16.msrb.mxu3 %v4308_v14  ;;  %v4333_v5 = vld [vmem:[%s6109_s3 + $0x490] sm:$0xff]  ;;  %2898 = vmatpush.bf16.msra.mxu0 %v4321_v45  ;;  %v4316_v35 = vld [vmem:[%s6109_s3 + $0x408] sm:$0xff] }
 0x284   : > { %v1369_v6 = vpack.c.bf16 %v1323_v61, %v1323_v61  ;;  %3038 = vmatpush.bf16.msra.mxu2 %v4333_v5  ;;  %2965 = vmatpush.bf16.msra.mxu1 %v4330_v16  ;;  %v4345_v45 = vld [vmem:[%s6109_s3 + $0x4f0] sm:$0xff] }
 0x285   : > { %v2710_v4 = vunpack.c.l.b16 %v1370_v1  ;;  %v1364_v51 = vpack.c.bf16 %v1318_v48, %v1318_v48  ;;  %v4346_v1 = vld [vmem:[%s6109_s3 + $0x4f8] sm:$0xff] }
 0x286   : > { %v2709_v58 = vunpack.c.l.b16 %v1369_v6  ;;  %v4370_v6 = vld [vmem:[%s6109_s3 + $0x5b8] sm:$0xff] }
 0x287   : > { %v2506_v10 = vunpack.c.l.b16 %v1364_v51  ;;  %v1208_v8 = vpop.xlane.xlu2 %1207  ;;  %2836 = vmatpush.bf16.msrb.mxu3 %v4307_v50  ;;  %2899 = vmatpush.bf16.msra.mxu0 %v4320_v0  ;;  %v4325_v50 = vld [vmem:[%s6109_s3 + $0x450] sm:$0xff] }
 0x288   : > { %v2711_v29 = vpack.c.b16 %v2710_v4, %v2709_v58  ;;  %4674 = vrcp.f32 %v1208_v8  ;;  %v1210_v17 = vpop.xlane.xlu1 %1209  ;;  %3039 = vmatpush.bf16.msra.mxu2 %v4332_v38  ;;  %2966 = vmatpush.bf16.msra.mxu1 %v4329_v3  ;;  %v4315_v58 = vld [vmem:[%s6109_s3 + $0x400] sm:$0xff]  ;;  %v4368_v38 = vld [vmem:[%s6109_s3 + $0x5a8] sm:$0xff] }
 0x289   : > { %v2507_v56 = vpack.c.b16 %v2506_v10, %v2505_v41  ;;  %v4673_v34 = vpop.eup %4672  ;;  %4676 = vrcp.f32 %v1210_v17  ;;  %v4369_v41 = vld [vmem:[%s6109_s3 + $0x5b0] sm:$0xff]  ;;  %v4324_v17 = vld [vmem:[%s6109_s3 + $0x448] sm:$0xff]  ;;  %v4343_v3 = vld [vmem:[%s6109_s3 + $0x4e0] sm:$0xff] }
 0x28a   : > { %2769 = vmatmul.bf16.vlgmr.msrb.gmra.mxu2 %v2711_v29  ;;  %v1212_v28 = vpop.xlane.xlu0 %1211  ;;  %v1319_v21 = vmul.f32 %v4673_v34, %v5463_v53 }
 0x28b   : > { %2565 = vmatmul.bf16.vlgmr.msra.gmra.mxu3 %v2507_v56  ;;  %4678 = vrcp.f32 %v1212_v28  ;;  %2900 = vmatpush.bf16.msra.mxu0 %v4319_v30  ;;  %v4344_v56 = vld [vmem:[%s6109_s3 + $0x4e8] sm:$0xff]  ;;  %v4367_v30 = vld [vmem:[%s6109_s3 + $0x5a0] sm:$0xff] }
 0x28c   : > { %v1365_v60 = vpack.c.bf16 %v1319_v21, %v1319_v21  ;;  %3040 = vmatpush.bf16.msra.mxu2 %v4331_v12  ;;  %2967 = vmatpush.bf16.msra.mxu1 %v4328_v63  ;;  %v4323_v21 = vld [vmem:[%s6109_s3 + $0x440] sm:$0xff] }
 0x28d   : > { %3101 = vmatpush.bf16.msra.mxu3 %v4346_v1 }
 0x28e   : > { %v4675_v59 = vpop.eup %4674 }
 0x28f   : > { %v4677_v53 = vpop.eup %4676  ;;  %v1320_v22 = vmul.f32 %v4675_v59, %v5478_v52  ;;  %2901 = vmatpush.bf16.msra.mxu0 %v4318_v2  ;;  %v2573_v52 = vunpack.c.l.b16 %v1365_v60 }
 0x290   : > { %v1321_v25 = vmul.f32 %v4677_v53, %v5483_v31  ;;  %2968 = vmatpush.bf16.msra.mxu1 %v4327_v11  ;;  %3305 = vmatpush.bf16.msrb.mxu2 %v4370_v6 }
 0x291   : > { %v4679_v27 = vpop.eup %4678  ;;  %v1366_v36 = vpack.c.bf16 %v1320_v22, %v1320_v22  ;;  %3102 = vmatpush.bf16.msra.mxu3 %v4345_v45  ;;  %v4352_v45 = vld [vmem:[%s6109_s3 + $0x528] sm:$0xff] }
 0x292   : > { %v1367_v49 = vpack.c.bf16 %v1321_v25, %v1321_v25  ;;  %v1322_v32 = vmul.f32 %v4679_v27, %v5497_v42  ;;  %v1220_v55 = vpop.xlane.xlu1 %1219  ;;  %v4342_v25 = vld [vmem:[%s6109_s3 + $0x4d8] sm:$0xff] }
 0x293   : > { %v2574_v46 = vunpack.c.l.b16 %v1366_v36  ;;  %4680 = vrcp.f32 %v1220_v55  ;;  %2902 = vmatpush.bf16.msra.mxu0 %v4317_v23  ;;  %v4366_v27 = vld [vmem:[%s6109_s3 + $0x598] sm:$0xff] }
 0x294   : > { %v1368_v31 = vpack.c.bf16 %v1322_v32, %v1322_v32  ;;  %v1954_v14 = vpop.f32.mrf.mxu2  ;;  %v2641_v7 = vunpack.c.l.b16 %v1367_v49  ;;  %2969 = vmatpush.bf16.msra.mxu1 %v4326_v15  ;;  %3306 = vmatpush.bf16.msrb.mxu2 %v4369_v41  ;;  %v4353_v15 = vld [vmem:[%s6109_s3 + $0x530] sm:$0xff] }
 0x295   : > { %3323 = vst [vmem:[%s5894_s6 + $0x20] sm:$0xff] %v1954_v14  ;;  %v2575_v42 = vpack.c.b16 %v2574_v46, %v2573_v52  ;;  %3103 = vmatpush.bf16.msra.mxu3 %v4344_v56  ;;  %v4365_v52 = vld [vmem:[%s6109_s3 + $0x590] sm:$0xff]  ;;  %v4340_v14 = vld [vmem:[%s6109_s3 + $0x4c8] sm:$0xff] }
 0x296   : > { %v2642_v20 = vunpack.c.l.b16 %v1368_v31 }
 0x297   : > { %2633 = vmatmul.bf16.vlgmr.msrb.gmra.mxu0 %v2575_v42  ;;  %v4364_v42 = vld [vmem:[%s6109_s3 + $0x588] sm:$0xff] }
 0x298   : > { %v1218_v61 = vpop.xlane.xlu2 %1217  ;;  %v2643_v48 = vpack.c.b16 %v2642_v20, %v2641_v7  ;;  %2903 = vmatpush.bf16.msra.mxu0 %v4316_v35  ;;  %2970 = vmatpush.bf16.msra.mxu1 %v4325_v50  ;;  %v4354_v7 = vld [vmem:[%s6109_s3 + $0x538] sm:$0xff]  ;;  %v4339_v20 = vld [vmem:[%s6109_s3 + $0x4c0] sm:$0xff] }
 0x299   : > { %4682 = vrcp.f32 %v1218_v61  ;;  %v4681_v4 = vpop.eup %4680  ;;  %3307 = vmatpush.bf16.msrb.mxu2 %v4368_v38  ;;  %3104 = vmatpush.bf16.msra.mxu3 %v4343_v3  ;;  %v4363_v61 = vld [vmem:[%s6109_s3 + $0x580] sm:$0xff] }
 0x29a   : > { %2701 = vmatmul.bf16.vlgmr.msrb.gmra.mxu1 %v2643_v48  ;;  %v1326_v51 = vmul.f32 %v4681_v4, %v5516_v37 }
 0x29c   : > { %v1956_v5 = vpop.f32.mrf.mxu2  ;;  %2904 = vmatpush.bf16.msra.mxu0 %v4315_v58  ;;  %v1372_v8 = vpack.c.bf16 %v1326_v51, %v1326_v51  ;;  %2971 = vmatpush.bf16.msra.mxu1 %v4324_v17 }
 0x29d   : > { %3324 = vst [vmem:[%s5894_s6 + $0x28] sm:$0xff] %v1956_v5  ;;  %3308 = vmatpush.bf16.msrb.mxu2 %v4367_v30  ;;  %3105 = vmatpush.bf16.msra.mxu3 %v4342_v25  ;;  %v4362_v5 = vld [vmem:[%s6109_s3 + $0x578] sm:$0xff] }
 0x29e   : > { %v1818_v10 = vpop.f32.mrf.mxu0 }
 0x29f   : > { %v4683_v37 = vpop.eup %4682  ;;  %3319 = vst [vmem:[%s5894_s6] sm:$0xff] %v1818_v10  ;;  %v1230_v16 = vpop.xlane.xlu0 %1229 }
 0x2a0   : > { %v1325_v29 = vmul.f32 %v4683_v37, %v5528_v19  ;;  %4684 = vrcp.f32 %v1230_v16  ;;  %v1232_v0 = vpop.xlane.xlu2 %1231  ;;  %v2778_v19 = vunpack.c.l.b16 %v1372_v8  ;;  %2972 = vmatpush.bf16.msra.mxu1 %v4323_v21  ;;  %3169 = vmatpush.bf16.msrb.mxu0 %v4354_v7  ;;  %v4361_v16 = vld [vmem:[%s6109_s3 + $0x570] sm:$0xff] }
 0x2a1   : > { %4686 = vrcp.f32 %v1232_v0  ;;  %3309 = vmatpush.bf16.msrb.mxu2 %v4366_v27  ;;  %v4348_v27 = vld [vmem:[%s6109_s3 + $0x508] sm:$0xff] }
 0x2a2   : > { %v1371_v34 = vpack.c.bf16 %v1325_v29, %v1325_v29  ;;  %v4351_v29 = vld [vmem:[%s6109_s3 + $0x520] sm:$0xff] }
 0x2a4   : > { %v2777_v28 = vunpack.c.l.b16 %v1371_v34  ;;  %3170 = vmatpush.bf16.msrb.mxu0 %v4353_v15  ;;  %3237 = vmatpush.bf16.msrb.mxu1 %v4362_v5  ;;  %v4350_v34 = vld [vmem:[%s6109_s3 + $0x518] sm:$0xff] }
 0x2a5   : > { %v1886_v12 = vpop.f32.mrf.mxu1  ;;  %3310 = vmatpush.bf16.msrb.mxu2 %v4365_v52  ;;  %v4357_v52 = vld [vmem:[%s6109_s3 + $0x550] sm:$0xff] }
 0x2a6   : > { %v2779_v59 = vpack.c.b16 %v2778_v19, %v2777_v28  ;;  %v4685_v53 = vpop.eup %4684  ;;  %3321 = vst [vmem:[%s5894_s6 + $0x10] sm:$0xff] %v1886_v12  ;;  %v1820_v60 = vpop.f32.mrf.mxu0  ;;  %v4360_v19 = vld [vmem:[%s6109_s3 + $0x568] sm:$0xff] }
 0x2a7   : > { %v4687_v22 = vpop.eup %4686  ;;  %v1331_v63 = vmul.f32 %v4685_v53, %v5546_v18  ;;  %3320 = vst [vmem:[%s5894_s6 + $0x8] sm:$0xff] %v1820_v60  ;;  %v4341_v18 = vld [vmem:[%s6109_s3 + $0x4d0] sm:$0xff]  ;;  %v4359_v60 = vld [vmem:[%s6109_s3 + $0x560] sm:$0xff] }
 0x2a8   : > { %2837 = vmatmul.bf16.vlgmr.msrb.gmra.mxu3 %v2779_v59  ;;  %v1332_v2 = vmul.f32 %v4687_v22, %v5551_v9  ;;  %3171 = vmatpush.bf16.msrb.mxu0 %v4352_v45  ;;  %v4349_v53 = vld [vmem:[%s6109_s3 + $0x510] sm:$0xff] }
 0x2a9   : > { %v1377_v36 = vpack.c.bf16 %v1331_v63, %v1331_v63  ;;  %3106 = vmatpush.bf16.msra.mxu3 %v4341_v18  ;;  %3311 = vmatpush.bf16.msrb.mxu2 %v4364_v42  ;;  %v4356_v42 = vld [vmem:[%s6109_s3 + $0x548] sm:$0xff] }
 0x2aa   : > { %v1378_v49 = vpack.c.bf16 %v1332_v2, %v1332_v2  ;;  %v1226_v11 = vpop.xlane.xlu2 %1225  ;;  %3238 = vmatpush.bf16.msrb.mxu1 %v4361_v16 }
 0x2ab   : > { %v2981_v32 = vunpack.c.l.b16 %v1377_v36  ;;  %v4358_v36 = vld [vmem:[%s6109_s3 + $0x558] sm:$0xff] }
 0x2ac   : > { %v2982_v55 = vunpack.c.l.b16 %v1378_v49  ;;  %3172 = vmatpush.bf16.msrb.mxu0 %v4351_v29 }
 0x2ad   : > { %v1888_v46 = vpop.f32.mrf.mxu1  ;;  %3107 = vmatpush.bf16.msra.mxu3 %v4340_v14  ;;  %3312 = vmatpush.bf16.msrb.mxu2 %v4363_v61 }
 0x2ae   : > { %3322 = vst [vmem:[%s5894_s6 + $0x18] sm:$0xff] %v1888_v46  ;;  %v2983_v9 = vpack.c.b16 %v2982_v55, %v2981_v32  ;;  %3239 = vmatpush.bf16.msrb.mxu1 %v4360_v19  ;;  %v4347_v55 = vld [vmem:[%s6109_s3 + $0x500] sm:$0xff] }
 0x2af   : > { %v1222_v31 = vpop.xlane.xlu1 %1221 }
 0x2b0   : > { %4688 = vrcp.f32 %v1222_v31  ;;  %3041 = vmatmul.bf16.vlgmr.msra.gmra.mxu2 %v2983_v9  ;;  %v1224_v23 = vpop.xlane.xlu0 %1223  ;;  %3173 = vmatpush.bf16.msrb.mxu0 %v4350_v34 }
 0x2b1   : > { %4690 = vrcp.f32 %v1224_v23  ;;  %3108 = vmatpush.bf16.msra.mxu3 %v4339_v20 }
 0x2b2   : > { %4692 = vrcp.f32 %v1226_v11  ;;  %3240 = vmatpush.bf16.msrb.mxu1 %v4359_v60 }
 0x2b4   : > { %3174 = vmatpush.bf16.msrb.mxu0 %v4349_v53 }
 0x2b6   : > { %v4689_v1 = vpop.eup %4688  ;;  %3241 = vmatpush.bf16.msrb.mxu1 %v4358_v36 }
 0x2b7   : > { %v4691_v48 = vpop.eup %4690  ;;  %v1327_v35 = vmul.f32 %v4689_v1, %v5593_v24  ;;  %v1228_v6 = vpop.xlane.xlu1 %1227 }
 0x2b8   : > { %v4693_v4 = vpop.eup %4692  ;;  %v1328_v51 = vmul.f32 %v4691_v48, %v5601_v62  ;;  %4694 = vrcp.f32 %v1228_v6  ;;  %3175 = vmatpush.bf16.msrb.mxu0 %v4348_v27 }
 0x2b9   : > { %v1373_v50 = vpack.c.bf16 %v1327_v35, %v1327_v35  ;;  %v1329_v41 = vmul.f32 %v4693_v4, %v5580_v40 }
 0x2ba   : > { %v1374_v58 = vpack.c.bf16 %v1328_v51, %v1328_v51  ;;  %v1234_v24 = vpop.xlane.xlu0 %1233  ;;  %3242 = vmatpush.bf16.msrb.mxu1 %v4357_v52 }
 0x2bb   : > { %v2845_v37 = vunpack.c.l.b16 %v1373_v50  ;;  %v2022_v10 = vpop.f32.mrf.mxu3  ;;  %v1375_v0 = vpack.c.bf16 %v1329_v41, %v1329_v41  ;;  %4696 = vrcp.f32 %v1234_v24 }
 0x2bc   : > { %v2846_v8 = vunpack.c.l.b16 %v1374_v58  ;;  %3325 = vst [vmem:[%s5894_s6 + $0x30] sm:$0xff] %v2022_v10  ;;  %v2226_v62 = vpop.f32.mrf.mxu2  ;;  %3176 = vmatpush.bf16.msrb.mxu0 %v4347_v55 }
 0x2bd   : > { %3331 = vst [vmem:[%s5894_s6 + $0x60] sm:$0xff] %v2226_v62  ;;  %v2913_v21 = vunpack.c.l.b16 %v1375_v0 }
 0x2be   : > { %v4695_v17 = vpop.eup %4694  ;;  %v2847_v56 = vpack.c.b16 %v2846_v8, %v2845_v37  ;;  %3243 = vmatpush.bf16.msrb.mxu1 %v4356_v42 }
 0x2bf   : > { %v1330_v40 = vmul.f32 %v4695_v17, %v5626_v13 }
 0x2c0   : > { %2905 = vmatmul.bf16.vlgmr.msra.gmra.mxu0 %v2847_v56 }
 0x2c1   : > { %v1376_v38 = vpack.c.bf16 %v1330_v40, %v1330_v40  ;;  %v4697_v63 = vpop.eup %4696 }
 0x2c2   : > { %v1248_v28 = vpop.xlane.xlu0 %1247  ;;  %v1333_v49 = vmul.f32 %v4697_v63, %v5642_v44 }
 0x2c3   : > { %v2914_v3 = vunpack.c.l.b16 %v1376_v38  ;;  %4698 = vrcp.f32 %v1248_v28  ;;  %v2024_v13 = vpop.f32.mrf.mxu3 }
 0x2c4   : > { %3326 = vst [vmem:[%s5894_s6 + $0x38] sm:$0xff] %v2024_v13  ;;  %v2228_v30 = vpop.f32.mrf.mxu2  ;;  %v1379_v31 = vpack.c.bf16 %v1333_v49, %v1333_v49 }
 0x2c5   : > { %3332 = vst [vmem:[%s5894_s6 + $0x68] sm:$0xff] %v2228_v30  ;;  %v2915_v59 = vpack.c.b16 %v2914_v3, %v2913_v21 }
 0x2c6   : > { %v2090_v12 = vpop.f32.mrf.mxu0  ;;  %v3049_v20 = vunpack.c.l.b16 %v1379_v31 }
 0x2c7   : > { %3327 = vst [vmem:[%s5894_s6 + $0x40] sm:$0xff] %v2090_v12  ;;  %v1236_v22 = vpop.xlane.xlu2 %1235  ;;  %2973 = vmatmul.bf16.vlgmr.msra.gmra.mxu1 %v2915_v59 }
 0x2c8   : > { %4700 = vrcp.f32 %v1236_v22  ;;  %v1246_v25 = vpop.xlane.xlu1 %1245 }
 0x2c9   : > { %v4699_v2 = vpop.eup %4698  ;;  %4702 = vrcp.f32 %v1246_v25 }
 0x2ca   : > { %v1340_v32 = vmul.f32 %v4699_v2, %v5673_v33 }
 0x2cc   : > { %v1386_v33 = vpack.c.bf16 %v1340_v32, %v1340_v32 }
 0x2ce   : > { %v2092_v18 = vpop.f32.mrf.mxu0  ;;  %v4701_v46 = vpop.eup %4700  ;;  %v3254_v15 = vunpack.c.l.b16 %v1386_v33 }
 0x2cf   : > { %3328 = vst [vmem:[%s5894_s6 + $0x48] sm:$0xff] %v2092_v18  ;;  %v2158_v9 = vpop.f32.mrf.mxu1  ;;  %v4703_v11 = vpop.eup %4702  ;;  %v1334_v44 = vmul.f32 %v4701_v46, %v5688_v57  ;;  %v4355_v57 = vld [vmem:[%s6109_s3 + $0x540] sm:$0xff] }
 0x2d0   : > { %3329 = vst [vmem:[%s5894_s6 + $0x50] sm:$0xff] %v2158_v9  ;;  %v1339_v14 = vmul.f32 %v4703_v11, %v5690_v26  ;;  %3244 = vmatpush.bf16.msrb.mxu1 %v4355_v57 }
 0x2d1   : > { %v1380_v23 = vpack.c.bf16 %v1334_v44, %v1334_v44 }
 0x2d2   : > { %v1385_v7 = vpack.c.bf16 %v1339_v14, %v1339_v14  ;;  %v1240_v26 = vpop.xlane.xlu1 %1239 }
 0x2d3   : > { %v3050_v61 = vunpack.c.l.b16 %v1380_v23  ;;  %4704 = vrcp.f32 %v1240_v26 }
 0x2d4   : > { %v3253_v1 = vunpack.c.l.b16 %v1385_v7 }
 0x2d5   : > { %v3051_v48 = vpack.c.b16 %v3050_v61, %v3049_v20 }
 0x2d6   : > { %v3255_v6 = vpack.c.b16 %v3254_v15, %v3253_v1 }
 0x2d7   : > { %v2160_v35 = vpop.f32.mrf.mxu1  ;;  %3109 = vmatmul.bf16.vlgmr.msra.gmra.mxu3 %v3051_v48 }
 0x2d8   : > { %3330 = vst [vmem:[%s5894_s6 + $0x58] sm:$0xff] %v2160_v35  ;;  %3313 = vmatmul.bf16.vlgmr.msrb.gmra.mxu2 %v3255_v6 }
 0x2d9   : > { %v4705_v50 = vpop.eup %4704 }
 0x2da   : > { %v1336_v45 = vmul.f32 %v4705_v50, %v5729_v39 }
 0x2dc   : > { %v1382_v58 = vpack.c.bf16 %v1336_v45, %v1336_v45 }
 0x2de   : > { %v3118_v62 = vunpack.c.l.b16 %v1382_v58 }
 0x2df   : > { %v1242_v4 = vpop.xlane.xlu0 %1241 }
 0x2e1   : > { %v1238_v51 = vpop.xlane.xlu2 %1237 }
 0x2e2   : > { %4706 = vrcp.f32 %v1238_v51 }
 0x2e3   : > { %4708 = vrcp.f32 %v1242_v4 }
 0x2e8   : > { %v4707_v5 = vpop.eup %4706 }
 0x2e9   : > { %v1335_v24 = vmul.f32 %v4707_v5, %v5786_v43  ;;  %v1244_v41 = vpop.xlane.xlu2 %1243  ;;  %v4709_v37 = vpop.eup %4708 }
 0x2ea   : > { %4710 = vrcp.f32 %v1244_v41  ;;  %v1337_v29 = vmul.f32 %v4709_v37, %v5776_v47 }
 0x2eb   : > { %v1381_v10 = vpack.c.bf16 %v1335_v24, %v1335_v24  ;;  %v2498_v8 = vpop.f32.mrf.mxu2 }
 0x2ec   : > { %3339 = vst [vmem:[%s5894_s6 + $0xa0] sm:$0xff] %v2498_v8  ;;  %v1383_v0 = vpack.c.bf16 %v1337_v29, %v1337_v29 }
 0x2ed   : > { %v3117_v16 = vunpack.c.l.b16 %v1381_v10  ;;  %v2294_v17 = vpop.f32.mrf.mxu3 }
 0x2ee   : > { %3333 = vst [vmem:[%s5894_s6 + $0x70] sm:$0xff] %v2294_v17  ;;  %v3185_v34 = vunpack.c.l.b16 %v1383_v0 }
 0x2ef   : > { %v3119_v39 = vpack.c.b16 %v3118_v62, %v3117_v16 }
 0x2f0   : > { %v4711_v56 = vpop.eup %4710 }
 0x2f1   : > { %v1338_v43 = vmul.f32 %v4711_v56, %v5815_v54  ;;  %3177 = vmatmul.bf16.vlgmr.msrb.gmra.mxu0 %v3119_v39 }
 0x2f3   : > { %v1384_v40 = vpack.c.bf16 %v1338_v43, %v1338_v43  ;;  %v2500_v38 = vpop.f32.mrf.mxu2 }
 0x2f4   : > { %3340 = vst [vmem:[%s5894_s6 + $0xa8] sm:$0xff] %v2500_v38 }
 0x2f5   : > { %v3186_v47 = vunpack.c.l.b16 %v1384_v40  ;;  %v2296_v19 = vpop.f32.mrf.mxu3 }
 0x2f6   : > { %v2362_v28 = vpop.f32.mrf.mxu0  ;;  %3334 = vst [vmem:[%s5894_s6 + $0x78] sm:$0xff] %v2296_v19 }
 0x2f7   : > { %3335 = vst [vmem:[%s5894_s6 + $0x80] sm:$0xff] %v2362_v28  ;;  %v3187_v21 = vpack.c.b16 %v3186_v47, %v3185_v34 }
 0x2f9   : > { %3245 = vmatmul.bf16.vlgmr.msrb.gmra.mxu1 %v3187_v21 }
 0x2fe   : > { %v2364_v54 = vpop.f32.mrf.mxu0 }
 0x2ff   : > { %3336 = vst [vmem:[%s5894_s6 + $0x88] sm:$0xff] %v2364_v54  ;;  %v2430_v3 = vpop.f32.mrf.mxu1 }
 0x300   : > { %3337 = vst [vmem:[%s5894_s6 + $0x90] sm:$0xff] %v2430_v3 }
 0x307   : > { %v2432_v13 = vpop.f32.mrf.mxu1 }
 0x308   : > { %3338 = vst [vmem:[%s5894_s6 + $0x98] sm:$0xff] %v2432_v13 }
 0x30d   : > { %v2770_v30 = vpop.f32.mrf.mxu2 }
 0x30e   : > { %3347 = vst [vmem:[%s5894_s6 + $0xe0] sm:$0xff] %v2770_v30  ;;  %v2566_v12 = vpop.f32.mrf.mxu3 }
 0x30f   : > { %3341 = vst [vmem:[%s5894_s6 + $0xb0] sm:$0xff] %v2566_v12 }
 0x314   : > { %v2634_v53 = vpop.f32.mrf.mxu0 }
 0x315   : > { %v2772_v59 = vpop.f32.mrf.mxu2  ;;  %3343 = vst [vmem:[%s5894_s6 + $0xc0] sm:$0xff] %v2634_v53 }
 0x316   : > { %3348 = vst [vmem:[%s5894_s6 + $0xe8] sm:$0xff] %v2772_v59  ;;  %v2568_v60 = vpop.f32.mrf.mxu3 }
 0x317   : > { %3342 = vst [vmem:[%s5894_s6 + $0xb8] sm:$0xff] %v2568_v60  ;;  %v2702_v22 = vpop.f32.mrf.mxu1 }
 0x318   : > { %3345 = vst [vmem:[%s5894_s6 + $0xd0] sm:$0xff] %v2702_v22 }
 0x31c   : > { %v2636_v63 = vpop.f32.mrf.mxu0 }
 0x31d   : > { %3344 = vst [vmem:[%s5894_s6 + $0xc8] sm:$0xff] %v2636_v63 }
 0x31f   : > { %v2704_v25 = vpop.f32.mrf.mxu1 }
 0x320   : > { %3346 = vst [vmem:[%s5894_s6 + $0xd8] sm:$0xff] %v2704_v25 }
 0x32b   : > { %v2838_v2 = vpop.f32.mrf.mxu3 }
 0x32c   : > { %3349 = vst [vmem:[%s5894_s6 + $0xf0] sm:$0xff] %v2838_v2 }
 0x333   : > { %v2840_v27 = vpop.f32.mrf.mxu3  ;;  %v3042_v36 = vpop.f32.mrf.mxu2 }
 0x334   : > { %3350 = vst [vmem:[%s5894_s6 + $0xf8] sm:$0xff] %v2840_v27 }
 0x335   : > { %3355 = vst [vmem:[%s5894_s6 + $0x120] sm:$0xff] %v3042_v36 }
 0x33b   : > { %v3044_v49 = vpop.f32.mrf.mxu2 }
 0x33c   : > { %3356 = vst [vmem:[%s5894_s6 + $0x128] sm:$0xff] %v3044_v49 }
 0x33d   : > { %v2906_v32 = vpop.f32.mrf.mxu0 }
 0x33e   : > { %3351 = vst [vmem:[%s5894_s6 + $0x100] sm:$0xff] %v2906_v32 }
 0x344   : > { %v2974_v18 = vpop.f32.mrf.mxu1 }
 0x345   : > { %3353 = vst [vmem:[%s5894_s6 + $0x110] sm:$0xff] %v2974_v18  ;;  %v2908_v55 = vpop.f32.mrf.mxu0 }
 0x346   : > { %3352 = vst [vmem:[%s5894_s6 + $0x108] sm:$0xff] %v2908_v55 }
 0x34c   : > { %v2976_v52 = vpop.f32.mrf.mxu1 }
 0x34d   : > { %3354 = vst [vmem:[%s5894_s6 + $0x118] sm:$0xff] %v2976_v52 }
 0x35a   : > { %v3110_v46 = vpop.f32.mrf.mxu3 }
 0x35b   : > { %3357 = vst [vmem:[%s5894_s6 + $0x130] sm:$0xff] %v3110_v46  ;;  %v3314_v9 = vpop.f32.mrf.mxu2 }
 0x35c   : > { %3363 = vst [vmem:[%s5894_s6 + $0x160] sm:$0xff] %v3314_v9 }
 0x362   : > { %v3112_v11 = vpop.f32.mrf.mxu3 }
 0x363   : > { %3358 = vst [vmem:[%s5894_s6 + $0x138] sm:$0xff] %v3112_v11  ;;  %v3316_v31 = vpop.f32.mrf.mxu2 }
 0x364   : > { %3364 = vst [vmem:[%s5894_s6 + $0x168] sm:$0xff] %v3316_v31 }
 0x36e   : > { %v3178_v44 = vpop.f32.mrf.mxu0 }
 0x36f   : > { %3359 = vst [vmem:[%s5894_s6 + $0x140] sm:$0xff] %v3178_v44 }
 0x376   : > { %v3180_v33 = vpop.f32.mrf.mxu0  ;;  %v3246_v14 = vpop.f32.mrf.mxu1 }
 0x377   : > { %3360 = vst [vmem:[%s5894_s6 + $0x148] sm:$0xff] %v3180_v33 }
 0x378   : > { %3361 = vst [vmem:[%s5894_s6 + $0x150] sm:$0xff] %v3246_v14 }
 0x37e   : > { %v3248_v23 = vpop.f32.mrf.mxu1 }
 0x37f   : > { %3362 = vst [vmem:[%s5894_s6 + $0x158] sm:$0xff] %v3248_v23 }
 0x380   : > { %4739 = shalt.err (!%p4736_p3)
}
 0x381   : > { %s4776_s7 = smov 128   ;;  %s4777_s6 = smov 8  }
 0x382   : > { %4374 = dma.vmem_to_hbm [thread:$0]  (%p4841_p5), %s3379_s13, 5888, %s3381_s14, %s3366_s20, %s4776_s7, %s4776_s7, %s4777_s6  }
 0x383 PF: > { %p4380_p4 = scmp.ge.s32.totalorder %s4774_s18, 2  ;;  %s3395_s5 = sand.u32 1, %s4762_s15  }
 0x384   : > { %s3396_s8 = scalar_lea.sflag [#allocation3], %s3395_s5 }
 0x385   : > { %p4377_p7 = pnand %p4380_p4, %p4845_p6 }
 0x387   : > { %p4378_p8 = pneg %p4377_p7 }
 0x389   : > { %4757 = dma.done.wait (%p4378_p8), %s3396_s8, 5888  }
 0x38a   : > { %4759 = vsyncadd (%p4378_p8), %s3396_s8, 4294961408  ;;  %p14_p9 = scmp.ge.s32.totalorder %s4828_s21, 4   ;;  %s6130_s15 = smov %s4766_s16 }
 0x38b   : > { %s6131_s16 = smov %s4770_s17  ;;  %s6132_s17 = smov %s4839_s24 }
 0x38c   : > { %s6133_s18 = smov %s4828_s21  ;;  %16 = sbr.rel (!%p14_p9) target bundleno = 3 (0x3), region = 71 }
 0x391   :  { %3402 = vsyncpa [#allocation3], 1 }
 0x392   :  { %3404 = vsyncpa [#allocation3 + $0x1], 1 }

</bundles_post_ra>
